<compile_context>
chip_gen: v7x
topology: tpu7x:2x2x1
jax: 0.10.0
libtpu: 0.0.40
codegen_flags: <defaults>
</compile_context>

<pallas_src>
import functools
import math

import jax
import jax.numpy as jnp
import numpy as np
from jax.experimental import pallas as pl
from jax.experimental.pallas import tpu as pltpu


# ----------------------------------------------------------------------------
# In-kernel math helpers (VPU / EUP friendly, no exotic primitives).
# ----------------------------------------------------------------------------
def _erf(z):
    # Abramowitz & Stegun 7.1.26 rational approximation, |error| <= 1.5e-7.
    a1, a2, a3, a4, a5 = (0.254829592, -0.284496736, 1.421413741,
                          -1.453152027, 1.061405429)
    pp = 0.3275911
    az = jnp.abs(z)
    t = 1.0 / (1.0 + pp * az)
    poly = ((((a5 * t + a4) * t + a3) * t + a2) * t + a1) * t
    y = 1.0 - poly * jnp.exp(-(az * az))
    return jnp.where(z < 0.0, -y, y)


def _gelu_exact(z):
    # torch.nn.functional.gelu default (erf-based) form.
    return 0.5 * z * (1.0 + _erf(z * (1.0 / math.sqrt(2.0))))


def _layernorm(z, gamma, beta, eps=1e-6):
    mu = jnp.mean(z, axis=-1, keepdims=True)
    var = jnp.mean(jnp.square(z - mu), axis=-1, keepdims=True)
    return (z - mu) * jax.lax.rsqrt(var + eps) * gamma + beta


# ----------------------------------------------------------------------------
# Fused Encoder kernel: one grid step = one (batch element, layer) pair.
# ----------------------------------------------------------------------------
def encoder_kernel(x_ref, ln1_ref, wqkv_ref, bqkv_ref, wo_ref, bo_ref,
                   ln2_ref, w1_ref, b1_ref, w2_ref, b2_ref, encn_ref,
                   out_ref, h_ref, *, num_heads):
    layer = pl.program_id(1)
    num_layers = pl.num_programs(1)
    S, D = h_ref.shape
    Dh = D // num_heads

    # First layer step for this batch element: load input into the resident
    # VMEM residual-stream scratch (stays in VMEM for all layer steps).
    @pl.when(layer == 0)
    def _():
        h_ref[...] = x_ref[0].astype(jnp.float32)

    x = h_ref[...]                                        # (S, D) residual stream

    # Per-layer weights (tiny at these sizes; load once, slice as values).
    ln1 = ln1_ref[0]                                      # (2, D)  gamma/beta
    wqkv = wqkv_ref[0]                                    # (D, 3D)
    bqkv = bqkv_ref[0]                                    # (1, 3D)
    wo = wo_ref[0]                                        # (D, D)
    bo = bo_ref[0]                                        # (1, D)
    ln2 = ln2_ref[0]                                      # (2, D)
    w1 = w1_ref[0]                                        # (D, M)
    b1 = b1_ref[0]                                        # (1, M)
    w2 = w2_ref[0]                                        # (M, D)
    b2 = b2_ref[0]                                        # (1, D)

    # ---- Multi-head self-attention sub-block ----
    xn = _layernorm(x, ln1[0:1, :], ln1[1:2, :])
    qkv = jnp.dot(xn, wqkv, preferred_element_type=jnp.float32) + bqkv   # (S, 3D)

    scale = 1.0 / math.sqrt(Dh)
    attn = jnp.zeros((S, D), jnp.float32)
    for h in range(num_heads):
        q_h = qkv[:, h * Dh:(h + 1) * Dh]                 # (S, Dh)
        k_h = qkv[:, D + h * Dh:D + (h + 1) * Dh]         # (S, Dh)
        v_h = qkv[:, 2 * D + h * Dh:2 * D + (h + 1) * Dh]  # (S, Dh)
        # scores = q_h @ k_h^T  (contract last dims, no transpose materialized)
        s = jax.lax.dot_general(q_h, k_h, (((1,), (1,)), ((), ())),
                                preferred_element_type=jnp.float32) * scale
        s = s - jnp.max(s, axis=-1, keepdims=True)
        p = jnp.exp(s)
        p = p / jnp.sum(p, axis=-1, keepdims=True)
        ctx_h = jnp.dot(p, v_h, preferred_element_type=jnp.float32)      # (S, Dh)
        # concat_h(ctx_h) @ Wo  ==  sum_h ctx_h @ Wo[h*Dh:(h+1)*Dh, :]
        attn = attn + jnp.dot(ctx_h, wo[h * Dh:(h + 1) * Dh, :],
                              preferred_element_type=jnp.float32)
    x = x + attn + bo                                     # residual 1 (+ out bias)

    # ---- MLP sub-block ----
    yn = _layernorm(x, ln2[0:1, :], ln2[1:2, :])
    hid = jnp.dot(yn, w1, preferred_element_type=jnp.float32) + b1
    hid = _gelu_exact(hid)
    mlp = jnp.dot(hid, w2, preferred_element_type=jnp.float32) + b2
    x = x + mlp                                           # residual 2

    h_ref[...] = x

    # ---- Final encoder LayerNorm, written once per batch element ----
    @pl.when(layer == num_layers - 1)
    def _():
        encn = encn_ref[...]                              # (2, D)
        out = _layernorm(x, encn[0:1, :], encn[1:2, :])
        out_ref[0] = out.astype(out_ref.dtype)


# ----------------------------------------------------------------------------
# Host wrapper: single pallas_call over (batch, layers).
# ----------------------------------------------------------------------------
def encoder_forward(hidden_states, params, num_heads):
    """hidden_states: (B, S, D) float32. Returns (encoded (B,S,D), attn_weights=[])."""
    B, S, D = hidden_states.shape
    L = params["wqkv"].shape[0]
    M = params["w1"].shape[2]
    assert D % num_heads == 0

    kernel = functools.partial(encoder_kernel, num_heads=num_heads)

    encoded = pl.pallas_call(
        kernel,
        out_shape=jax.ShapeDtypeStruct((B, S, D), jnp.float32),
        grid=(B, L),
        in_specs=[
            pl.BlockSpec((1, S, D), lambda b, l: (b, 0, 0)),        # hidden_states
            pl.BlockSpec((1, 2, D), lambda b, l: (l, 0, 0)),        # ln1 gamma/beta
            pl.BlockSpec((1, D, 3 * D), lambda b, l: (l, 0, 0)),    # Wqkv
            pl.BlockSpec((1, 1, 3 * D), lambda b, l: (l, 0, 0)),    # bqkv
            pl.BlockSpec((1, D, D), lambda b, l: (l, 0, 0)),        # Wo
            pl.BlockSpec((1, 1, D), lambda b, l: (l, 0, 0)),        # bo
            pl.BlockSpec((1, 2, D), lambda b, l: (l, 0, 0)),        # ln2 gamma/beta
            pl.BlockSpec((1, D, M), lambda b, l: (l, 0, 0)),        # W1
            pl.BlockSpec((1, 1, M), lambda b, l: (l, 0, 0)),        # b1
            pl.BlockSpec((1, M, D), lambda b, l: (l, 0, 0)),        # W2
            pl.BlockSpec((1, 1, D), lambda b, l: (l, 0, 0)),        # b2
            pl.BlockSpec((2, D), lambda b, l: (0, 0)),              # encoder_norm
        ],
        out_specs=pl.BlockSpec((1, S, D), lambda b, l: (b, 0, 0)),
        scratch_shapes=[pltpu.VMEM((S, D), jnp.float32)],
        compiler_params=pltpu.CompilerParams(
            dimension_semantics=("parallel", "arbitrary"),
            vmem_limit_bytes=32 * 1024 * 1024,
        ),
    )(hidden_states, params["ln1"], params["wqkv"], params["bqkv"],
      params["wo"], params["bo"], params["ln2"], params["w1"], params["b1"],
      params["w2"], params["b2"], params["encn"])

    # TODO(synk): vis=True attention-probability outputs not materialized (vis=False path).
    # TODO(synk): Dropout layers are identity (eval mode); training-mode RNG dropout not implemented.
    return encoded, []


# ----------------------------------------------------------------------------
# Deterministic parameter construction (weights pre-transposed to (in, out)).
# ----------------------------------------------------------------------------
def init_encoder_params(key, num_layers, hidden, mlp_dim):
    L, D, M = num_layers, hidden, mlp_dim
    ks = jax.random.split(key, 14)

    def nrm(k, shape, std):
        return std * jax.random.normal(k, shape, dtype=jnp.float32)

    return {
        "ln1": jnp.stack([1.0 + nrm(ks[0], (L, D), 0.1), nrm(ks[1], (L, D), 0.05)], axis=1),
        "wqkv": nrm(ks[2], (L, D, 3 * D), 0.15),
        "bqkv": nrm(ks[3], (L, 1, 3 * D), 0.02),
        "wo": nrm(ks[4], (L, D, D), 0.15),
        "bo": nrm(ks[5], (L, 1, D), 0.02),
        "ln2": jnp.stack([1.0 + nrm(ks[6], (L, D), 0.1), nrm(ks[7], (L, D), 0.05)], axis=1),
        "w1": nrm(ks[8], (L, D, M), 0.12),
        "b1": nrm(ks[9], (L, 1, M), 0.02),
        "w2": nrm(ks[10], (L, M, D), 0.1),
        "b2": nrm(ks[11], (L, 1, D), 0.02),
        "encn": jnp.stack([1.0 + nrm(ks[12], (D,), 0.1), nrm(ks[13], (D,), 0.05)], axis=0),
    }


# ----------------------------------------------------------------------------
# Pure-JAX reference (mirrors the PyTorch Encoder forward, eval mode).
# ----------------------------------------------------------------------------
def encoder_reference(x, params, num_heads):
    P = jax.lax.Precision.HIGHEST
    B, S, D = x.shape
    L = params["wqkv"].shape[0]
    Dh = D // num_heads

    def layernorm(z, gamma, beta, eps=1e-6):
        mu = jnp.mean(z, axis=-1, keepdims=True)
        var = jnp.mean(jnp.square(z - mu), axis=-1, keepdims=True)
        return (z - mu) / jnp.sqrt(var + eps) * gamma + beta

    h = x.astype(jnp.float32)
    for l in range(L):
        xn = layernorm(h, params["ln1"][l, 0], params["ln1"][l, 1])
        qkv = jnp.einsum("bsd,de->bse", xn, params["wqkv"][l], precision=P) + params["bqkv"][l, 0]
        q, k, v = jnp.split(qkv, 3, axis=-1)
        q = q.reshape(B, S, num_heads, Dh).transpose(0, 2, 1, 3)
        k = k.reshape(B, S, num_heads, Dh).transpose(0, 2, 1, 3)
        v = v.reshape(B, S, num_heads, Dh).transpose(0, 2, 1, 3)
        scores = jnp.einsum("bhqd,bhkd->bhqk", q, k, precision=P) / math.sqrt(Dh)
        probs = jax.nn.softmax(scores, axis=-1)
        ctx = jnp.einsum("bhqk,bhkd->bhqd", probs, v, precision=P)
        ctx = ctx.transpose(0, 2, 1, 3).reshape(B, S, D)
        attn_out = jnp.einsum("bsd,de->bse", ctx, params["wo"][l], precision=P) + params["bo"][l, 0]
        h = h + attn_out
        yn = layernorm(h, params["ln2"][l, 0], params["ln2"][l, 1])
        hid = jnp.einsum("bsd,dm->bsm", yn, params["w1"][l], precision=P) + params["b1"][l, 0]
        hid = jax.nn.gelu(hid, approximate=False)
        mlp = jnp.einsum("bsm,md->bsd", hid, params["w2"][l], precision=P) + params["b2"][l, 0]
        h = h + mlp
    return layernorm(h, params["encn"][0], params["encn"][1])


# ----------------------------------------------------------------------------
if __name__ == "__main__":
    key = jax.random.PRNGKey(0)
    k_x, k_p = jax.random.split(key)

    B, S, D = 2, 8, 32            # batch, seq, hidden_size
    num_heads = 4                  # config.transformer['num_heads']
    mlp_dim = 128                  # config.transformer['mlp_dim']
    num_layers = 3                 # config.transformer['num_layers']

    x = jax.random.normal(k_x, (B, S, D), dtype=jnp.float32)
    params = init_encoder_params(k_p, num_layers, D, mlp_dim)

    encoded, attn_weights = encoder_forward(x, params, num_heads)
    encoded = jax.block_until_ready(encoded)

    ref = jax.block_until_ready(encoder_reference(x, params, num_heads))
    np.testing.assert_allclose(np.asarray(encoded), np.asarray(ref),
                               rtol=5e-4, atol=5e-5)

    print("KERNEL_OK")
</pallas_src>

<mosaic_0001>
module attributes {stable_mosaic.version = 11 : i64} {
  func.func @encoder_kernel(%arg0: i32, %arg1: i32, %arg2: memref<1x8x32xf32, #tpu.memory_space<vmem>>, %arg3: memref<1x2x32xf32, #tpu.memory_space<vmem>>, %arg4: memref<1x32x96xf32, #tpu.memory_space<vmem>>, %arg5: memref<1x1x96xf32, #tpu.memory_space<vmem>>, %arg6: memref<1x32x32xf32, #tpu.memory_space<vmem>>, %arg7: memref<1x1x32xf32, #tpu.memory_space<vmem>>, %arg8: memref<1x2x32xf32, #tpu.memory_space<vmem>>, %arg9: memref<1x32x128xf32, #tpu.memory_space<vmem>>, %arg10: memref<1x1x128xf32, #tpu.memory_space<vmem>>, %arg11: memref<1x128x32xf32, #tpu.memory_space<vmem>>, %arg12: memref<1x1x32xf32, #tpu.memory_space<vmem>>, %arg13: memref<2x32xf32, #tpu.memory_space<vmem>>, %arg14: memref<1x8x32xf32, #tpu.memory_space<vmem>>, %arg15: memref<8x32xf32, #tpu.memory_space<vmem>>) attributes {dimension_semantics = [#tpu.dimension_semantics<parallel>, #tpu.dimension_semantics<arbitrary>], iteration_bounds = array<i64: 2, 3>, scalar_prefetch = 0 : i64, scratch_operands = 1 : i64, tpu.core_type = #tpu.core_type<tc>, window_params = [{transform_indices = @transform_0, window_bounds = array<i64: 1, 8, 32>}, {transform_indices = @transform_1, window_bounds = array<i64: 1, 2, 32>}, {transform_indices = @transform_2, window_bounds = array<i64: 1, 32, 96>}, {transform_indices = @transform_3, window_bounds = array<i64: 1, 1, 96>}, {transform_indices = @transform_4, window_bounds = array<i64: 1, 32, 32>}, {transform_indices = @transform_5, window_bounds = array<i64: 1, 1, 32>}, {transform_indices = @transform_6, window_bounds = array<i64: 1, 2, 32>}, {transform_indices = @transform_7, window_bounds = array<i64: 1, 32, 128>}, {transform_indices = @transform_8, window_bounds = array<i64: 1, 1, 128>}, {transform_indices = @transform_9, window_bounds = array<i64: 1, 128, 32>}, {transform_indices = @transform_10, window_bounds = array<i64: 1, 1, 32>}, {pipeline_mode = #tpu.pipeline_mode<synchronous>, transform_indices = @transform_11, window_bounds = array<i64: 2, 32>}, {transform_indices = @transform_12, window_bounds = array<i64: 1, 8, 32>}]} {
    %c0_i32 = arith.constant 0 : i32
    %0 = arith.cmpi eq, %arg1, %c0_i32 : i32
    %1 = arith.extui %0 : i1 to i32
    %c0_i32_0 = arith.constant 0 : i32
    %2 = arith.cmpi ne, %1, %c0_i32_0 : i32
    scf.if %2 {
      %c0_87 = arith.constant 0 : index
      %c0_88 = arith.constant 0 : index
      %c0_89 = arith.constant 0 : index
      %206 = vector.load %arg2[%c0_87, %c0_88, %c0_89] : memref<1x8x32xf32, #tpu.memory_space<vmem>>, vector<1x8x32xf32>
      %207 = vector.shape_cast %206 : vector<1x8x32xf32> to vector<8x32xf32>
      %c0_90 = arith.constant 0 : index
      %c0_91 = arith.constant 0 : index
      %208 = vector.load %arg15[%c0_90, %c0_91] : memref<8x32xf32, #tpu.memory_space<vmem>>, vector<8x32xf32>
      tpu.vector_store %arg15[%c0_90, %c0_91], %207 {strides = array<i32>} : memref<8x32xf32, #tpu.memory_space<vmem>>, vector<8x32xf32>,
    } else {
    }
    %c0 = arith.constant 0 : index
    %c0_1 = arith.constant 0 : index
    %3 = vector.load %arg15[%c0, %c0_1] : memref<8x32xf32, #tpu.memory_space<vmem>>, vector<8x32xf32>
    %c0_2 = arith.constant 0 : index
    %c0_3 = arith.constant 0 : index
    %c0_4 = arith.constant 0 : index
    %4 = vector.load %arg3[%c0_2, %c0_3, %c0_4] : memref<1x2x32xf32, #tpu.memory_space<vmem>>, vector<1x2x32xf32>
    %5 = vector.shape_cast %4 : vector<1x2x32xf32> to vector<2x32xf32>
    %c0_5 = arith.constant 0 : index
    %c0_6 = arith.constant 0 : index
    %c0_7 = arith.constant 0 : index
    %6 = vector.load %arg4[%c0_5, %c0_6, %c0_7] : memref<1x32x96xf32, #tpu.memory_space<vmem>>, vector<1x32x96xf32>
    %7 = vector.shape_cast %6 : vector<1x32x96xf32> to vector<32x96xf32>
    %c0_8 = arith.constant 0 : index
    %c0_9 = arith.constant 0 : index
    %c0_10 = arith.constant 0 : index
    %8 = vector.load %arg5[%c0_8, %c0_9, %c0_10] : memref<1x1x96xf32, #tpu.memory_space<vmem>>, vector<1x1x96xf32>
    %9 = vector.shape_cast %8 : vector<1x1x96xf32> to vector<1x96xf32>
    %c0_11 = arith.constant 0 : index
    %c0_12 = arith.constant 0 : index
    %c0_13 = arith.constant 0 : index
    %10 = vector.load %arg6[%c0_11, %c0_12, %c0_13] : memref<1x32x32xf32, #tpu.memory_space<vmem>>, vector<1x32x32xf32>
    %11 = vector.shape_cast %10 : vector<1x32x32xf32> to vector<32x32xf32>
    %c0_14 = arith.constant 0 : index
    %c0_15 = arith.constant 0 : index
    %c0_16 = arith.constant 0 : index
    %12 = vector.load %arg7[%c0_14, %c0_15, %c0_16] : memref<1x1x32xf32, #tpu.memory_space<vmem>>, vector<1x1x32xf32>
    %13 = vector.shape_cast %12 : vector<1x1x32xf32> to vector<1x32xf32>
    %c0_17 = arith.constant 0 : index
    %c0_18 = arith.constant 0 : index
    %c0_19 = arith.constant 0 : index
    %14 = vector.load %arg8[%c0_17, %c0_18, %c0_19] : memref<1x2x32xf32, #tpu.memory_space<vmem>>, vector<1x2x32xf32>
    %15 = vector.shape_cast %14 : vector<1x2x32xf32> to vector<2x32xf32>
    %c0_20 = arith.constant 0 : index
    %c0_21 = arith.constant 0 : index
    %c0_22 = arith.constant 0 : index
    %16 = vector.load %arg9[%c0_20, %c0_21, %c0_22] : memref<1x32x128xf32, #tpu.memory_space<vmem>>, vector<1x32x128xf32>
    %17 = vector.shape_cast %16 : vector<1x32x128xf32> to vector<32x128xf32>
    %c0_23 = arith.constant 0 : index
    %c0_24 = arith.constant 0 : index
    %c0_25 = arith.constant 0 : index
    %18 = vector.load %arg10[%c0_23, %c0_24, %c0_25] : memref<1x1x128xf32, #tpu.memory_space<vmem>>, vector<1x1x128xf32>
    %19 = vector.shape_cast %18 : vector<1x1x128xf32> to vector<1x128xf32>
    %c0_26 = arith.constant 0 : index
    %c0_27 = arith.constant 0 : index
    %c0_28 = arith.constant 0 : index
    %20 = vector.load %arg11[%c0_26, %c0_27, %c0_28] : memref<1x128x32xf32, #tpu.memory_space<vmem>>, vector<1x128x32xf32>
    %21 = vector.shape_cast %20 : vector<1x128x32xf32> to vector<128x32xf32>
    %c0_29 = arith.constant 0 : index
    %c0_30 = arith.constant 0 : index
    %c0_31 = arith.constant 0 : index
    %22 = vector.load %arg12[%c0_29, %c0_30, %c0_31] : memref<1x1x32xf32, #tpu.memory_space<vmem>>, vector<1x1x32xf32>
    %23 = vector.shape_cast %22 : vector<1x1x32xf32> to vector<1x32xf32>
    %24 = vector.extract_strided_slice %5 {offsets = [0, 0], sizes = [1, 32], strides = [1, 1]} : vector<2x32xf32> to vector<1x32xf32>
    %25 = vector.extract_strided_slice %5 {offsets = [1, 0], sizes = [1, 32], strides = [1, 1]} : vector<2x32xf32> to vector<1x32xf32>
    %cst = arith.constant dense<0.000000e+00> : vector<8xf32>
    %26 = vector.multi_reduction <add>, %3, %cst [1] : vector<8x32xf32> to vector<8xf32>
    %27 = vector.shape_cast %26 : vector<8xf32> to vector<8x1xf32>
    %cst_32 = arith.constant 3.200000e+01 : f32
    %28 = vector.broadcast %cst_32 : f32 to vector<8x1xf32>
    %29 = arith.divf %27, %28 : vector<8x1xf32>
    %30 = vector.broadcast %29 : vector<8x1xf32> to vector<8x32xf32>
    %31 = arith.subf %3, %30 : vector<8x32xf32>
    %32 = arith.mulf %31, %31 : vector<8x32xf32>
    %cst_33 = arith.constant dense<0.000000e+00> : vector<8xf32>
    %33 = vector.multi_reduction <add>, %32, %cst_33 [1] : vector<8x32xf32> to vector<8xf32>
    %34 = vector.shape_cast %33 : vector<8xf32> to vector<8x1xf32>
    %cst_34 = arith.constant 3.200000e+01 : f32
    %35 = vector.broadcast %cst_34 : f32 to vector<8x1xf32>
    %36 = arith.divf %34, %35 : vector<8x1xf32>
    %37 = vector.broadcast %29 : vector<8x1xf32> to vector<8x32xf32>
    %38 = arith.subf %3, %37 : vector<8x32xf32>
    %cst_35 = arith.constant 9.99999997E-7 : f32
    %39 = vector.broadcast %cst_35 : f32 to vector<8x1xf32>
    %40 = arith.addf %36, %39 : vector<8x1xf32>
    %41 = math.rsqrt %40 : vector<8x1xf32>
    %42 = vector.broadcast %41 : vector<8x1xf32> to vector<8x32xf32>
    %43 = arith.mulf %38, %42 : vector<8x32xf32>
    %44 = vector.broadcast %24 : vector<1x32xf32> to vector<8x32xf32>
    %45 = arith.mulf %43, %44 : vector<8x32xf32>
    %46 = vector.broadcast %25 : vector<1x32xf32> to vector<8x32xf32>
    %47 = arith.addf %45, %46 : vector<8x32xf32>
    %cst_36 = arith.constant dense<0.000000e+00> : vector<8x96xf32>
    %48 = tpu.matmul %47, %7, %cst_36 {dimension_numbers = #tpu.dot_dimension_numbers<[1], [0], [0], [1], [0, 0, 1, 1], [], []>} : vector<8x32xf32>, vector<32x96xf32>, vector<8x96xf32> -> vector<8x96xf32>
    %49 = vector.broadcast %9 : vector<1x96xf32> to vector<8x96xf32>
    %50 = arith.addf %48, %49 : vector<8x96xf32>
    %cst_37 = arith.constant 0.000000e+00 : f32
    %51 = vector.broadcast %cst_37 : f32 to vector<8x32xf32>
    %52 = vector.extract_strided_slice %50 {offsets = [0, 0], sizes = [8, 8], strides = [1, 1]} : vector<8x96xf32> to vector<8x8xf32>
    %53 = vector.extract_strided_slice %50 {offsets = [0, 32], sizes = [8, 8], strides = [1, 1]} : vector<8x96xf32> to vector<8x8xf32>
    %54 = vector.extract_strided_slice %50 {offsets = [0, 64], sizes = [8, 8], strides = [1, 1]} : vector<8x96xf32> to vector<8x8xf32>
    %cst_38 = arith.constant dense<0.000000e+00> : vector<8x8xf32>
    %55 = tpu.matmul %52, %53, %cst_38 {dimension_numbers = #tpu.dot_dimension_numbers<[1], [1], [0], [0], [0, 0, 1, 0], [], []>} : vector<8x8xf32>, vector<8x8xf32>, vector<8x8xf32> -> vector<8x8xf32>
    %cst_39 = arith.constant 0.353553385 : f32
    %56 = vector.broadcast %cst_39 : f32 to vector<8x8xf32>
    %57 = arith.mulf %55, %56 : vector<8x8xf32>
    %cst_40 = arith.constant dense<0xFF800000> : vector<8xf32>
    %58 = vector.multi_reduction <maximumf>, %57, %cst_40 [1] : vector<8x8xf32> to vector<8xf32>
    %59 = vector.shape_cast %58 : vector<8xf32> to vector<8x1xf32>
    %60 = vector.broadcast %59 : vector<8x1xf32> to vector<8x8xf32>
    %61 = arith.subf %57, %60 : vector<8x8xf32>
    %62 = math.exp %61 : vector<8x8xf32>
    %cst_41 = arith.constant dense<0.000000e+00> : vector<8xf32>
    %63 = vector.multi_reduction <add>, %62, %cst_41 [1] : vector<8x8xf32> to vector<8xf32>
    %64 = vector.shape_cast %63 : vector<8xf32> to vector<8x1xf32>
    %65 = vector.broadcast %64 : vector<8x1xf32> to vector<8x8xf32>
    %66 = arith.divf %62, %65 : vector<8x8xf32>
    %cst_42 = arith.constant dense<0.000000e+00> : vector<8x8xf32>
    %67 = tpu.matmul %66, %54, %cst_42 {dimension_numbers = #tpu.dot_dimension_numbers<[1], [0], [0], [1], [0, 0, 1, 1], [], []>} : vector<8x8xf32>, vector<8x8xf32>, vector<8x8xf32> -> vector<8x8xf32>
    %68 = vector.extract_strided_slice %11 {offsets = [0, 0], sizes = [8, 32], strides = [1, 1]} : vector<32x32xf32> to vector<8x32xf32>
    %cst_43 = arith.constant dense<0.000000e+00> : vector<8x32xf32>
    %69 = tpu.matmul %67, %68, %cst_43 {dimension_numbers = #tpu.dot_dimension_numbers<[1], [0], [0], [1], [0, 0, 1, 1], [], []>} : vector<8x8xf32>, vector<8x32xf32>, vector<8x32xf32> -> vector<8x32xf32>
    %70 = arith.addf %51, %69 : vector<8x32xf32>
    %71 = vector.extract_strided_slice %50 {offsets = [0, 8], sizes = [8, 8], strides = [1, 1]} : vector<8x96xf32> to vector<8x8xf32>
    %72 = vector.extract_strided_slice %50 {offsets = [0, 40], sizes = [8, 8], strides = [1, 1]} : vector<8x96xf32> to vector<8x8xf32>
    %73 = vector.extract_strided_slice %50 {offsets = [0, 72], sizes = [8, 8], strides = [1, 1]} : vector<8x96xf32> to vector<8x8xf32>
    %cst_44 = arith.constant dense<0.000000e+00> : vector<8x8xf32>
    %74 = tpu.matmul %71, %72, %cst_44 {dimension_numbers = #tpu.dot_dimension_numbers<[1], [1], [0], [0], [0, 0, 1, 0], [], []>} : vector<8x8xf32>, vector<8x8xf32>, vector<8x8xf32> -> vector<8x8xf32>
    %cst_45 = arith.constant 0.353553385 : f32
    %75 = vector.broadcast %cst_45 : f32 to vector<8x8xf32>
    %76 = arith.mulf %74, %75 : vector<8x8xf32>
    %cst_46 = arith.constant dense<0xFF800000> : vector<8xf32>
    %77 = vector.multi_reduction <maximumf>, %76, %cst_46 [1] : vector<8x8xf32> to vector<8xf32>
    %78 = vector.shape_cast %77 : vector<8xf32> to vector<8x1xf32>
    %79 = vector.broadcast %78 : vector<8x1xf32> to vector<8x8xf32>
    %80 = arith.subf %76, %79 : vector<8x8xf32>
    %81 = math.exp %80 : vector<8x8xf32>
    %cst_47 = arith.constant dense<0.000000e+00> : vector<8xf32>
    %82 = vector.multi_reduction <add>, %81, %cst_47 [1] : vector<8x8xf32> to vector<8xf32>
    %83 = vector.shape_cast %82 : vector<8xf32> to vector<8x1xf32>
    %84 = vector.broadcast %83 : vector<8x1xf32> to vector<8x8xf32>
    %85 = arith.divf %81, %84 : vector<8x8xf32>
    %cst_48 = arith.constant dense<0.000000e+00> : vector<8x8xf32>
    %86 = tpu.matmul %85, %73, %cst_48 {dimension_numbers = #tpu.dot_dimension_numbers<[1], [0], [0], [1], [0, 0, 1, 1], [], []>} : vector<8x8xf32>, vector<8x8xf32>, vector<8x8xf32> -> vector<8x8xf32>
    %87 = vector.extract_strided_slice %11 {offsets = [8, 0], sizes = [8, 32], strides = [1, 1]} : vector<32x32xf32> to vector<8x32xf32>
    %cst_49 = arith.constant dense<0.000000e+00> : vector<8x32xf32>
    %88 = tpu.matmul %86, %87, %cst_49 {dimension_numbers = #tpu.dot_dimension_numbers<[1], [0], [0], [1], [0, 0, 1, 1], [], []>} : vector<8x8xf32>, vector<8x32xf32>, vector<8x32xf32> -> vector<8x32xf32>
    %89 = arith.addf %70, %88 : vector<8x32xf32>
    %90 = vector.extract_strided_slice %50 {offsets = [0, 16], sizes = [8, 8], strides = [1, 1]} : vector<8x96xf32> to vector<8x8xf32>
    %91 = vector.extract_strided_slice %50 {offsets = [0, 48], sizes = [8, 8], strides = [1, 1]} : vector<8x96xf32> to vector<8x8xf32>
    %92 = vector.extract_strided_slice %50 {offsets = [0, 80], sizes = [8, 8], strides = [1, 1]} : vector<8x96xf32> to vector<8x8xf32>
    %cst_50 = arith.constant dense<0.000000e+00> : vector<8x8xf32>
    %93 = tpu.matmul %90, %91, %cst_50 {dimension_numbers = #tpu.dot_dimension_numbers<[1], [1], [0], [0], [0, 0, 1, 0], [], []>} : vector<8x8xf32>, vector<8x8xf32>, vector<8x8xf32> -> vector<8x8xf32>
    %cst_51 = arith.constant 0.353553385 : f32
    %94 = vector.broadcast %cst_51 : f32 to vector<8x8xf32>
    %95 = arith.mulf %93, %94 : vector<8x8xf32>
    %cst_52 = arith.constant dense<0xFF800000> : vector<8xf32>
    %96 = vector.multi_reduction <maximumf>, %95, %cst_52 [1] : vector<8x8xf32> to vector<8xf32>
    %97 = vector.shape_cast %96 : vector<8xf32> to vector<8x1xf32>
    %98 = vector.broadcast %97 : vector<8x1xf32> to vector<8x8xf32>
    %99 = arith.subf %95, %98 : vector<8x8xf32>
    %100 = math.exp %99 : vector<8x8xf32>
    %cst_53 = arith.constant dense<0.000000e+00> : vector<8xf32>
    %101 = vector.multi_reduction <add>, %100, %cst_53 [1] : vector<8x8xf32> to vector<8xf32>
    %102 = vector.shape_cast %101 : vector<8xf32> to vector<8x1xf32>
    %103 = vector.broadcast %102 : vector<8x1xf32> to vector<8x8xf32>
    %104 = arith.divf %100, %103 : vector<8x8xf32>
    %cst_54 = arith.constant dense<0.000000e+00> : vector<8x8xf32>
    %105 = tpu.matmul %104, %92, %cst_54 {dimension_numbers = #tpu.dot_dimension_numbers<[1], [0], [0], [1], [0, 0, 1, 1], [], []>} : vector<8x8xf32>, vector<8x8xf32>, vector<8x8xf32> -> vector<8x8xf32>
    %106 = vector.extract_strided_slice %11 {offsets = [16, 0], sizes = [8, 32], strides = [1, 1]} : vector<32x32xf32> to vector<8x32xf32>
    %cst_55 = arith.constant dense<0.000000e+00> : vector<8x32xf32>
    %107 = tpu.matmul %105, %106, %cst_55 {dimension_numbers = #tpu.dot_dimension_numbers<[1], [0], [0], [1], [0, 0, 1, 1], [], []>} : vector<8x8xf32>, vector<8x32xf32>, vector<8x32xf32> -> vector<8x32xf32>
    %108 = arith.addf %89, %107 : vector<8x32xf32>
    %109 = vector.extract_strided_slice %50 {offsets = [0, 24], sizes = [8, 8], strides = [1, 1]} : vector<8x96xf32> to vector<8x8xf32>
    %110 = vector.extract_strided_slice %50 {offsets = [0, 56], sizes = [8, 8], strides = [1, 1]} : vector<8x96xf32> to vector<8x8xf32>
    %111 = vector.extract_strided_slice %50 {offsets = [0, 88], sizes = [8, 8], strides = [1, 1]} : vector<8x96xf32> to vector<8x8xf32>
    %cst_56 = arith.constant dense<0.000000e+00> : vector<8x8xf32>
    %112 = tpu.matmul %109, %110, %cst_56 {dimension_numbers = #tpu.dot_dimension_numbers<[1], [1], [0], [0], [0, 0, 1, 0], [], []>} : vector<8x8xf32>, vector<8x8xf32>, vector<8x8xf32> -> vector<8x8xf32>
    %cst_57 = arith.constant 0.353553385 : f32
    %113 = vector.broadcast %cst_57 : f32 to vector<8x8xf32>
    %114 = arith.mulf %112, %113 : vector<8x8xf32>
    %cst_58 = arith.constant dense<0xFF800000> : vector<8xf32>
    %115 = vector.multi_reduction <maximumf>, %114, %cst_58 [1] : vector<8x8xf32> to vector<8xf32>
    %116 = vector.shape_cast %115 : vector<8xf32> to vector<8x1xf32>
    %117 = vector.broadcast %116 : vector<8x1xf32> to vector<8x8xf32>
    %118 = arith.subf %114, %117 : vector<8x8xf32>
    %119 = math.exp %118 : vector<8x8xf32>
    %cst_59 = arith.constant dense<0.000000e+00> : vector<8xf32>
    %120 = vector.multi_reduction <add>, %119, %cst_59 [1] : vector<8x8xf32> to vector<8xf32>
    %121 = vector.shape_cast %120 : vector<8xf32> to vector<8x1xf32>
    %122 = vector.broadcast %121 : vector<8x1xf32> to vector<8x8xf32>
    %123 = arith.divf %119, %122 : vector<8x8xf32>
    %cst_60 = arith.constant dense<0.000000e+00> : vector<8x8xf32>
    %124 = tpu.matmul %123, %111, %cst_60 {dimension_numbers = #tpu.dot_dimension_numbers<[1], [0], [0], [1], [0, 0, 1, 1], [], []>} : vector<8x8xf32>, vector<8x8xf32>, vector<8x8xf32> -> vector<8x8xf32>
    %125 = vector.extract_strided_slice %11 {offsets = [24, 0], sizes = [8, 32], strides = [1, 1]} : vector<32x32xf32> to vector<8x32xf32>
    %cst_61 = arith.constant dense<0.000000e+00> : vector<8x32xf32>
    %126 = tpu.matmul %124, %125, %cst_61 {dimension_numbers = #tpu.dot_dimension_numbers<[1], [0], [0], [1], [0, 0, 1, 1], [], []>} : vector<8x8xf32>, vector<8x32xf32>, vector<8x32xf32> -> vector<8x32xf32>
    %127 = arith.addf %108, %126 : vector<8x32xf32>
    %128 = arith.addf %3, %127 : vector<8x32xf32>
    %129 = vector.broadcast %13 : vector<1x32xf32> to vector<8x32xf32>
    %130 = arith.addf %128, %129 : vector<8x32xf32>
    %131 = vector.extract_strided_slice %15 {offsets = [0, 0], sizes = [1, 32], strides = [1, 1]} : vector<2x32xf32> to vector<1x32xf32>
    %132 = vector.extract_strided_slice %15 {offsets = [1, 0], sizes = [1, 32], strides = [1, 1]} : vector<2x32xf32> to vector<1x32xf32>
    %cst_62 = arith.constant dense<0.000000e+00> : vector<8xf32>
    %133 = vector.multi_reduction <add>, %130, %cst_62 [1] : vector<8x32xf32> to vector<8xf32>
    %134 = vector.shape_cast %133 : vector<8xf32> to vector<8x1xf32>
    %cst_63 = arith.constant 3.200000e+01 : f32
    %135 = vector.broadcast %cst_63 : f32 to vector<8x1xf32>
    %136 = arith.divf %134, %135 : vector<8x1xf32>
    %137 = vector.broadcast %136 : vector<8x1xf32> to vector<8x32xf32>
    %138 = arith.subf %130, %137 : vector<8x32xf32>
    %139 = arith.mulf %138, %138 : vector<8x32xf32>
    %cst_64 = arith.constant dense<0.000000e+00> : vector<8xf32>
    %140 = vector.multi_reduction <add>, %139, %cst_64 [1] : vector<8x32xf32> to vector<8xf32>
    %141 = vector.shape_cast %140 : vector<8xf32> to vector<8x1xf32>
    %cst_65 = arith.constant 3.200000e+01 : f32
    %142 = vector.broadcast %cst_65 : f32 to vector<8x1xf32>
    %143 = arith.divf %141, %142 : vector<8x1xf32>
    %144 = vector.broadcast %136 : vector<8x1xf32> to vector<8x32xf32>
    %145 = arith.subf %130, %144 : vector<8x32xf32>
    %cst_66 = arith.constant 9.99999997E-7 : f32
    %146 = vector.broadcast %cst_66 : f32 to vector<8x1xf32>
    %147 = arith.addf %143, %146 : vector<8x1xf32>
    %148 = math.rsqrt %147 : vector<8x1xf32>
    %149 = vector.broadcast %148 : vector<8x1xf32> to vector<8x32xf32>
    %150 = arith.mulf %145, %149 : vector<8x32xf32>
    %151 = vector.broadcast %131 : vector<1x32xf32> to vector<8x32xf32>
    %152 = arith.mulf %150, %151 : vector<8x32xf32>
    %153 = vector.broadcast %132 : vector<1x32xf32> to vector<8x32xf32>
    %154 = arith.addf %152, %153 : vector<8x32xf32>
    %cst_67 = arith.constant dense<0.000000e+00> : vector<8x128xf32>
    %155 = tpu.matmul %154, %17, %cst_67 {dimension_numbers = #tpu.dot_dimension_numbers<[1], [0], [0], [1], [0, 0, 1, 1], [], []>} : vector<8x32xf32>, vector<32x128xf32>, vector<8x128xf32> -> vector<8x128xf32>
    %156 = vector.broadcast %19 : vector<1x128xf32> to vector<8x128xf32>
    %157 = arith.addf %155, %156 : vector<8x128xf32>
    %cst_68 = arith.constant 5.000000e-01 : f32
    %158 = vector.broadcast %cst_68 : f32 to vector<8x128xf32>
    %159 = arith.mulf %158, %157 : vector<8x128xf32>
    %cst_69 = arith.constant 0.707106769 : f32
    %160 = vector.broadcast %cst_69 : f32 to vector<8x128xf32>
    %161 = arith.mulf %157, %160 : vector<8x128xf32>
    %162 = math.absf %161 : vector<8x128xf32>
    %cst_70 = arith.constant 0.327591091 : f32
    %163 = vector.broadcast %cst_70 : f32 to vector<8x128xf32>
    %164 = arith.mulf %163, %162 : vector<8x128xf32>
    %cst_71 = arith.constant 1.000000e+00 : f32
    %165 = vector.broadcast %cst_71 : f32 to vector<8x128xf32>
    %166 = arith.addf %165, %164 : vector<8x128xf32>
    %cst_72 = arith.constant 1.000000e+00 : f32
    %167 = vector.broadcast %cst_72 : f32 to vector<8x128xf32>
    %168 = arith.divf %167, %166 : vector<8x128xf32>
    %cst_73 = arith.constant 1.06140542 : f32
    %169 = vector.broadcast %cst_73 : f32 to vector<8x128xf32>
    %170 = arith.mulf %169, %168 : vector<8x128xf32>
    %cst_74 = arith.constant -1.45315206 : f32
    %171 = vector.broadcast %cst_74 : f32 to vector<8x128xf32>
    %172 = arith.addf %170, %171 : vector<8x128xf32>
    %173 = arith.mulf %172, %168 : vector<8x128xf32>
    %cst_75 = arith.constant 1.42141378 : f32
    %174 = vector.broadcast %cst_75 : f32 to vector<8x128xf32>
    %175 = arith.addf %173, %174 : vector<8x128xf32>
    %176 = arith.mulf %175, %168 : vector<8x128xf32>
    %cst_76 = arith.constant -0.284496725 : f32
    %177 = vector.broadcast %cst_76 : f32 to vector<8x128xf32>
    %178 = arith.addf %176, %177 : vector<8x128xf32>
    %179 = arith.mulf %178, %168 : vector<8x128xf32>
    %cst_77 = arith.constant 0.254829586 : f32
    %180 = vector.broadcast %cst_77 : f32 to vector<8x128xf32>
    %181 = arith.addf %179, %180 : vector<8x128xf32>
    %182 = arith.mulf %181, %168 : vector<8x128xf32>
    %183 = arith.mulf %162, %162 : vector<8x128xf32>
    %cst_78 = arith.constant 0.000000e+00 : f32
    %184 = vector.broadcast %cst_78 : f32 to vector<8x128xf32>
    %185 = arith.subf %184, %183 : vector<8x128xf32>
    %186 = math.exp %185 : vector<8x128xf32>
    %187 = arith.mulf %182, %186 : vector<8x128xf32>
    %cst_79 = arith.constant 1.000000e+00 : f32
    %188 = vector.broadcast %cst_79 : f32 to vector<8x128xf32>
    %189 = arith.subf %188, %187 : vector<8x128xf32>
    %cst_80 = arith.constant 0.000000e+00 : f32
    %190 = vector.broadcast %cst_80 : f32 to vector<8x128xf32>
    %191 = arith.cmpf olt, %161, %190 : vector<8x128xf32>
    %cst_81 = arith.constant 0.000000e+00 : f32
    %192 = vector.broadcast %cst_81 : f32 to vector<8x128xf32>
    %193 = arith.subf %192, %189 : vector<8x128xf32>
    %194 = arith.select %191, %193, %189 : vector<8x128xi1>, vector<8x128xf32>
    %cst_82 = arith.constant 1.000000e+00 : f32
    %195 = vector.broadcast %cst_82 : f32 to vector<8x128xf32>
    %196 = arith.addf %195, %194 : vector<8x128xf32>
    %197 = arith.mulf %159, %196 : vector<8x128xf32>
    %cst_83 = arith.constant dense<0.000000e+00> : vector<8x32xf32>
    %198 = tpu.matmul %197, %21, %cst_83 {dimension_numbers = #tpu.dot_dimension_numbers<[1], [0], [0], [1], [0, 0, 1, 1], [], []>} : vector<8x128xf32>, vector<128x32xf32>, vector<8x32xf32> -> vector<8x32xf32>
    %199 = vector.broadcast %23 : vector<1x32xf32> to vector<8x32xf32>
    %200 = arith.addf %198, %199 : vector<8x32xf32>
    %201 = arith.addf %130, %200 : vector<8x32xf32>
    %c0_84 = arith.constant 0 : index
    %c0_85 = arith.constant 0 : index
    %202 = vector.load %arg15[%c0_84, %c0_85] : memref<8x32xf32, #tpu.memory_space<vmem>>, vector<8x32xf32>
    tpu.vector_store %arg15[%c0_84, %c0_85], %201 {strides = array<i32>} : memref<8x32xf32, #tpu.memory_space<vmem>>, vector<8x32xf32>,
    %c2_i32 = arith.constant 2 : i32
    %203 = arith.cmpi eq, %arg1, %c2_i32 : i32
    %204 = arith.extui %203 : i1 to i32
    %c0_i32_86 = arith.constant 0 : i32
    %205 = arith.cmpi ne, %204, %c0_i32_86 : i32
    scf.if %205 {
      %c0_87 = arith.constant 0 : index
      %c0_88 = arith.constant 0 : index
      %206 = vector.load %arg13[%c0_87, %c0_88] : memref<2x32xf32, #tpu.memory_space<vmem>>, vector<2x32xf32>
      %207 = vector.extract_strided_slice %206 {offsets = [0, 0], sizes = [1, 32], strides = [1, 1]} : vector<2x32xf32> to vector<1x32xf32>
      %208 = vector.extract_strided_slice %206 {offsets = [1, 0], sizes = [1, 32], strides = [1, 1]} : vector<2x32xf32> to vector<1x32xf32>
      %cst_89 = arith.constant dense<0.000000e+00> : vector<8xf32>
      %209 = vector.multi_reduction <add>, %201, %cst_89 [1] : vector<8x32xf32> to vector<8xf32>
      %210 = vector.shape_cast %209 : vector<8xf32> to vector<8x1xf32>
      %cst_90 = arith.constant 3.200000e+01 : f32
      %211 = vector.broadcast %cst_90 : f32 to vector<8x1xf32>
      %212 = arith.divf %210, %211 : vector<8x1xf32>
      %213 = vector.broadcast %212 : vector<8x1xf32> to vector<8x32xf32>
      %214 = arith.subf %201, %213 : vector<8x32xf32>
      %215 = arith.mulf %214, %214 : vector<8x32xf32>
      %cst_91 = arith.constant dense<0.000000e+00> : vector<8xf32>
      %216 = vector.multi_reduction <add>, %215, %cst_91 [1] : vector<8x32xf32> to vector<8xf32>
      %217 = vector.shape_cast %216 : vector<8xf32> to vector<8x1xf32>
      %cst_92 = arith.constant 3.200000e+01 : f32
      %218 = vector.broadcast %cst_92 : f32 to vector<8x1xf32>
      %219 = arith.divf %217, %218 : vector<8x1xf32>
      %220 = vector.broadcast %212 : vector<8x1xf32> to vector<8x32xf32>
      %221 = arith.subf %201, %220 : vector<8x32xf32>
      %cst_93 = arith.constant 9.99999997E-7 : f32
      %222 = vector.broadcast %cst_93 : f32 to vector<8x1xf32>
      %223 = arith.addf %219, %222 : vector<8x1xf32>
      %224 = math.rsqrt %223 : vector<8x1xf32>
      %225 = vector.broadcast %224 : vector<8x1xf32> to vector<8x32xf32>
      %226 = arith.mulf %221, %225 : vector<8x32xf32>
      %227 = vector.broadcast %207 : vector<1x32xf32> to vector<8x32xf32>
      %228 = arith.mulf %226, %227 : vector<8x32xf32>
      %229 = vector.broadcast %208 : vector<1x32xf32> to vector<8x32xf32>
      %230 = arith.addf %228, %229 : vector<8x32xf32>
      %c0_94 = arith.constant 0 : index
      %c0_95 = arith.constant 0 : index
      %c0_96 = arith.constant 0 : index
      %231 = vector.load %arg14[%c0_94, %c0_95, %c0_96] : memref<1x8x32xf32, #tpu.memory_space<vmem>>, vector<1x8x32xf32>
      %232 = vector.shape_cast %231 : vector<1x8x32xf32> to vector<8x32xf32>
      %233 = vector.shape_cast %230 : vector<8x32xf32> to vector<1x8x32xf32>
      tpu.vector_store %arg14[%c0_94, %c0_95, %c0_96], %233 {strides = array<i32>} : memref<1x8x32xf32, #tpu.memory_space<vmem>>, vector<1x8x32xf32>,
    } else {
    }
    return
  }
  func.func @transform_0(%arg0: i32, %arg1: i32) -> (i32, i32, i32) {
    %c0_i32 = arith.constant 0 : i32
    %c0_i32_0 = arith.constant 0 : i32
    %c0_i32_1 = arith.constant 0 : i32
    return %arg0, %c0_i32, %c0_i32_0 : i32, i32, i32
  }
  func.func @transform_1(%arg0: i32, %arg1: i32) -> (i32, i32, i32) {
    %c0_i32 = arith.constant 0 : i32
    %c0_i32_0 = arith.constant 0 : i32
    %c0_i32_1 = arith.constant 0 : i32
    return %arg1, %c0_i32, %c0_i32_0 : i32, i32, i32
  }
  func.func @transform_2(%arg0: i32, %arg1: i32) -> (i32, i32, i32) {
    %c0_i32 = arith.constant 0 : i32
    %c0_i32_0 = arith.constant 0 : i32
    %c0_i32_1 = arith.constant 0 : i32
    return %arg1, %c0_i32, %c0_i32_0 : i32, i32, i32
  }
  func.func @transform_3(%arg0: i32, %arg1: i32) -> (i32, i32, i32) {
    %c0_i32 = arith.constant 0 : i32
    %c0_i32_0 = arith.constant 0 : i32
    %c0_i32_1 = arith.constant 0 : i32
    return %arg1, %c0_i32, %c0_i32_0 : i32, i32, i32
  }
  func.func @transform_4(%arg0: i32, %arg1: i32) -> (i32, i32, i32) {
    %c0_i32 = arith.constant 0 : i32
    %c0_i32_0 = arith.constant 0 : i32
    %c0_i32_1 = arith.constant 0 : i32
    return %arg1, %c0_i32, %c0_i32_0 : i32, i32, i32
  }
  func.func @transform_5(%arg0: i32, %arg1: i32) -> (i32, i32, i32) {
    %c0_i32 = arith.constant 0 : i32
    %c0_i32_0 = arith.constant 0 : i32
    %c0_i32_1 = arith.constant 0 : i32
    return %arg1, %c0_i32, %c0_i32_0 : i32, i32, i32
  }
  func.func @transform_6(%arg0: i32, %arg1: i32) -> (i32, i32, i32) {
    %c0_i32 = arith.constant 0 : i32
    %c0_i32_0 = arith.constant 0 : i32
    %c0_i32_1 = arith.constant 0 : i32
    return %arg1, %c0_i32, %c0_i32_0 : i32, i32, i32
  }
  func.func @transform_7(%arg0: i32, %arg1: i32) -> (i32, i32, i32) {
    %c0_i32 = arith.constant 0 : i32
    %c0_i32_0 = arith.constant 0 : i32
    %c0_i32_1 = arith.constant 0 : i32
    return %arg1, %c0_i32, %c0_i32_0 : i32, i32, i32
  }
  func.func @transform_8(%arg0: i32, %arg1: i32) -> (i32, i32, i32) {
    %c0_i32 = arith.constant 0 : i32
    %c0_i32_0 = arith.constant 0 : i32
    %c0_i32_1 = arith.constant 0 : i32
    return %arg1, %c0_i32, %c0_i32_0 : i32, i32, i32
  }
  func.func @transform_9(%arg0: i32, %arg1: i32) -> (i32, i32, i32) {
    %c0_i32 = arith.constant 0 : i32
    %c0_i32_0 = arith.constant 0 : i32
    %c0_i32_1 = arith.constant 0 : i32
    return %arg1, %c0_i32, %c0_i32_0 : i32, i32, i32
  }
  func.func @transform_10(%arg0: i32, %arg1: i32) -> (i32, i32, i32) {
    %c0_i32 = arith.constant 0 : i32
    %c0_i32_0 = arith.constant 0 : i32
    %c0_i32_1 = arith.constant 0 : i32
    return %arg1, %c0_i32, %c0_i32_0 : i32, i32, i32
  }
  func.func @transform_11(%arg0: i32, %arg1: i32) -> (i32, i32) {
    %c0_i32 = arith.constant 0 : i32
    %c0_i32_0 = arith.constant 0 : i32
    %c0_i32_1 = arith.constant 0 : i32
    return %c0_i32, %c0_i32_0 : i32, i32
  }
  func.func @transform_12(%arg0: i32, %arg1: i32) -> (i32, i32, i32) {
    %c0_i32 = arith.constant 0 : i32
    %c0_i32_0 = arith.constant 0 : i32
    %c0_i32_1 = arith.constant 0 : i32
    return %arg0, %c0_i32, %c0_i32_0 : i32, i32, i32
  }
}

</mosaic_0001>

<bundles_post_ra>
// kernel: tpu_custom_call.1
= control target key start
LH: loop header
LB: loop body
LE: loop exit
PB: predicated region body
PF: predicated region fallthrough
CT: control target
= control target key end

     0   :  { %s3038_s0 = inlined_call_operand.vmem [shape: f32[2,8,32], index: 0, kind: input, shape index: {}]   ;;  %s3039_s1 = inlined_call_operand.vmem [shape: f32[3,2,32], index: 1, kind: input, shape index: {}]   ;;  %s3040_s2 = inlined_call_operand.vmem [shape: f32[3,32,96], index: 2, kind: input, shape index: {}]   ;;  %s3041_s3 = inlined_call_operand.vmem [shape: f32[3,1,96], index: 3, kind: input, shape index: {}]   ;;  %s3042_s4 = inlined_call_operand.vmem [shape: f32[3,32,32], index: 4, kind: input, shape index: {}]   ;;  %s3043_s5 = inlined_call_operand.vmem [shape: f32[3,1,32], index: 5, kind: input, shape index: {}]   ;;  %s3044_s6 = inlined_call_operand.vmem [shape: f32[3,2,32], index: 6, kind: input, shape index: {}]   ;;  %s3045_s7 = inlined_call_operand.vmem [shape: f32[3,32,128], index: 7, kind: input, shape index: {}]   ;;  %s3046_s8 = inlined_call_operand.vmem [shape: f32[3,1,128], index: 8, kind: input, shape index: {}]   ;;  %s3047_s9 = inlined_call_operand.vmem [shape: f32[3,128,32], index: 9, kind: input, shape index: {}]   ;;  %s3048_s10 = inlined_call_operand.vmem [shape: f32[3,1,32], index: 10, kind: input, shape index: {}]   ;;  %s3049_s11 = inlined_call_operand.vmem [shape: f32[2,32], index: 11, kind: input, shape index: {}]   ;;  %s3050_s12 = inlined_call_operand.hbm [shape: f32[2,8,32], index: 12, kind: output, shape index: {}]  }
   0x1   :  { %3065 = sst [smem:[#allocation18_spill]] %s3038_s0 }
   0x2   :  { %3066 = sst [smem:[#allocation19_spill]] %s3039_s1 }
   0x3   :  { %3067 = sst [smem:[#allocation20_spill]] %s3040_s2 }
   0x4   :  { %3068 = sst [smem:[#allocation21_spill]] %s3042_s4 }
   0x5   :  { %3069 = sst [smem:[#allocation22_spill]] %s3049_s11 }
   0x6   :  { %3070 = sst [smem:[#allocation23_spill]] %s3050_s12 }
   0x7   :  { %17 = vsyncpa [#allocation4], 0 }
   0x8   :  { %19 = vsyncpa [#allocation4 + $0x1], 0  ;;  %s2671_s21 = smov 0   ;;  %s2673_s22 = smov 0  }
   0x9   :  { %s2675_s23 = smov 0   ;;  %s2677_s24 = smov 0  }
   0xa   :  { %s2679_s25 = smov 0   ;;  %s2681_s26 = smov 0  }
   0xb   :  { %s2683_s27 = smov 0   ;;  %s2685_s28 = smov 0  }
   0xc LB: > { %3071 = sst [smem:[#allocation6_spill]] %s2561_s21  ;;  %s2131_s29 = sadd.s32 4294967295, %s2589_s28   ;;  %s2589_s28 = sphi %s2685_s28, %s25_s28   ;;  %s2585_s27 = sphi %s2683_s27, %s3107_s27   ;;  %s2581_s26 = sphi %s2681_s26, %s3106_s26   ;;  %s2577_s25 = sphi %s2679_s25, %s3105_s25   ;;  %s2573_s24 = sphi %s2677_s24, %s3104_s24   ;;  %s2569_s23 = sphi %s2675_s23, %s3103_s23   ;;  %s2565_s22 = sphi %s2673_s22, %s3102_s22   ;;  %s2561_s21 = sphi %s2671_s21, %s3101_s21  }
   0xd   : > { %3072 = sst [smem:[#allocation7_spill]] %s2565_s22  ;;  %s2132_s30 = sadd.s32 4294967294, %s2589_s28  }
   0xe   : > { %3073 = sst [smem:[#allocation8_spill]] %s2569_s23  ;;  %s34_s13 = sadd.s32 1, %s2581_s26 }
   0xf   : > { %3074 = sst [smem:[#allocation9_spill]] %s2577_s25  ;;  %p35_p0 = scmp.ge.s32.totalorder %s34_s13, 3 }
  0x10   : > { %3075 = sst [smem:[#allocation10_spill]] %s2581_s26  ;;  %s37_s14 = sadd.s32 1, %s2585_s27 }
  0x11   : > { %3076 = sst [smem:[#allocation11_spill]] %s2585_s27  ;;  %p361_p1 = scmp.ne.s32.totalorder %s2569_s23, %s2565_s22 }
  0x12   : > { %3077 = sst [smem:[#allocation12_spill]] %s2589_s28  ;;  %p362_p2 = scmp.eq.s32.totalorder %s2131_s29, 5 }
  0x13   : > { %s3109_s13 = smov (%p35_p0, %s34_s13), 0  ;;  %s3111_s14 = smov (!%p35_p0, %s37_s14), %s2585_s27 }
  0x14   : > { %3078 = sst [smem:[#allocation13_spill]] %s3109_s13  ;;  %p2720_p3 = por %p362_p2, %p361_p1 }
  0x15   : > { %p367_p4 = scmp.ne.s32.totalorder %s2565_s22, %s2561_s21  ;;  %p39_p5 = scmp.ge.s32.totalorder %s3111_s14, 2 }
  0x16   : > { %s3079_s15 = scalar_select %p2720_p3, 1, 0 }
  0x17   : > { %p368_p6 = scmp.eq.s32.totalorder %s2132_s30, 5  ;;  %p2135_p7 = scmp.ge.s32.totalorder %s2589_s28, 1 }
  0x18   : > { %3080 = sst [smem:[#allocation14_spill]] %s3079_s15  ;;  %p466_p8 = scmp.lt.s32.totalorder %s2589_s28, 7 }
  0x19   : > { %s3113_s14 = smov (%p39_p5, %s3111_s14), 0  ;;  %p2730_p9 = por %p368_p6, %p367_p4 }
  0x1a   : > { %3081 = sst [smem:[#allocation15_spill]] %s3113_s14  ;;  %p467_p10 = pnand %p2135_p7, %p466_p8 }
  0x1b   : > { %s3082_s16 = scalar_select %p2730_p9, 1, 0 }
  0x1c   : > { %s348_s17 = ssub.s32 %s2585_s27, %s3113_s14  ;;  %s351_s18 = sadd.s32 1, %s2569_s23 }
  0x1d   : > { %3083 = sst [smem:[#allocation16_spill]] %s3082_s16  ;;  %p349_p11 = scmp.eq.s32.totalorder %s348_s17, 0 }
  0x1e   : > { %470 = sbr.rel (%p467_p10) target bundleno = 4596 (0x11f4), region = 68  ;;  %s3054_s20 = sand.u32 (!%p467_p10), 1, %s2565_s22  }
  0x1f   : > { %s2738_s19 = scalar_select %p349_p11, %s2569_s23, %s351_s18  }
  0x20   : > { %p547_p12 = scmp.lt.s32.totalorder (!%p467_p10), %s2577_s25, 1  ;;  %s2744_s29 = sshll.u32 (!%p467_p10), %s3054_s20, 3 }
  0x21   : > { %3084 = sst [smem:[#allocation17_spill]] %s2738_s19  ;;  %p551_p13 = scmp.lt.s32.totalorder (!%p467_p10), %s2573_s24, 2 }
  0x22   : > { %s3085_s0 = sld [smem:[#allocation18_spill]] (!%p467_p10)  ;;  %s3086_s1 = sld [smem:[#allocation19_spill]] (!%p467_p10) }
  0x23   : > { %s3087_s2 = sld [smem:[#allocation20_spill]] (!%p467_p10)  ;;  %s3088_s4 = sld [smem:[#allocation21_spill]] (!%p467_p10) }
  0x24   : > { %p2148_p0 = scmp.ne.s32.totalorder (!%p467_p10), %s2573_s24, 0 }
  0x25   : > { %s548_s30 = scalar_select %p547_p12, %s2577_s25, 1 }
  0x26   : > { %s2749_s13 = scalar_select %p551_p13, %s2573_s24, 2 }
  0x27   : > { %s2137_s17 = sshll.u32 %s548_s30, 3  ;;  %vm596_vm0 = vcmask (!%p2148_p0), 261120  }
  0x28   : > { %s550_s27 = scalar_lea.vmem %s3085_s0, %s2137_s17  ;;  %s2138_s26 = sshll.u32 %s2749_s13, 1 }
  0x29   : > { %s2758_s23 = scalar_lea.vmem %s3086_s1, %s2138_s26  ;;  %s2176_s16 = sshll.u32 %s2749_s13, 5  ;;  %v595_v0 = vld [vmem:[%s550_s27] sm:$0xff] (!%p2148_p0) }
  0x2a   : > { %s2764_s12 = scalar_lea.vmem %s3087_s2, %s2176_s16  ;;  %s2773_s14 = scalar_lea.vmem %s3088_s4, %s2176_s16  ;;  %597 = vst.msk [vmem:[#allocation2] sm:$0xff] (!%p2148_p0), %vm596_vm0, %v595_v0 }
  0x2b   : > { %s2782_s1 = scalar_lea.vmem %s3044_s6, %s2138_s26  ;;  %s2787_s2 = scalar_lea.vmem %s3045_s7, %s2176_s16 }
  0x2c   : > { %s582_s11 = scalar_lea.vmem %s3046_s8, %s2749_s13  ;;  %s2179_s25 = sshll.u32 %s2749_s13, 7 }
  0x2d   : > { %s2797_s17 = scalar_lea.vmem %s3047_s9, %s2179_s25  ;;  %s590_s0 = scalar_lea.vmem %s3048_s10, %s2749_s13 }
  0x2e   : > { %s546_s26 = scalar_lea.vmem [#allocation3], %s2744_s29  ;;  %594 = sbr.rel (%p2148_p0) target bundleno = 53 (0x35), region = 72 }
  0x35 PF: > { %v2805_v1 = vld [vmem:[#allocation2] sm:$0xff]  ;;  %vm633_vm1 = vcmask 261120   ;;  %v601_v9 = vld [vmem:[%s2764_s12 + $0x8] sm:$0xff]  ;;  %v602_v10 = vld [vmem:[%s2764_s12 + $0x10] sm:$0xff]  ;;  %v2591_v11 = vmov 0.0|0.0   ;;  %vm2592_vm2 = vmmov 0   ;;  %v648_v18 = vlaneseq  ;;  %s3089_s27 = scalar_lea.vmem %s3041_s3, %s2749_s13 }
  0x36   : > { %v634_v2 = vsel %vm633_vm1, %v2805_v1, 0.0  ;;  %v600_v8 = vld [vmem:[%s2764_s12] sm:$0xff]  ;;  %2348 = vmatprep.subr.bf16.mxu0 %v2591_v11  ;;  %v603_v13 = vld [vmem:[%s2764_s12 + $0x18] sm:$0xff]  ;;  %v2593_v14 = vmov 0.0   ;;  %s2595_s16 = smov 96   ;;  %s2596_s30 = smov 88  }
  0x37   : > { %635 = vadd.xlane.f32.xlu0 %v634_v2  ;;  %v2349_v12 = vpack.c.bf16 %v601_v9, %v600_v8  ;;  %2239 = vmatprep.mubr.msk.f32.mxu0 %vm2592_vm2, %v2593_v14  ;;  %v2352_v15 = vpack.c.bf16 %v603_v13, %v602_v10  ;;  %v649_v20 = vshrl.u32 %v648_v18, 7  ;;  %v599_v22 = vld [vmem:[%s2758_s23] sm:$0x3]  ;;  %s2594_s23 = smov 64   ;;  %vm740_vm3 = vcmask 64512   ;;  %s2597_s19 = smov 120  }
  0x38   : > { %2267 = vmatprep.subr.mxu1 %v2593_v14  ;;  %2269 = vmatprep.mubr.msk.f32.mxu1 %vm2592_vm2, %v2593_v14  ;;  %v2149_v30 = vld [vmem:[%s3089_s27] ss:$0 sm:$0xff]  ;;  %s2598_s20 = smov 56   ;;  %s2599_s21 = smov 80  }
  0x39   : > { %2350 = vmatpush3.bf16.msra.mxu0 %v2349_v12  ;;  %v2823_v21 = vsub.s32 0, %v649_v20  ;;  %v2826_v23 = vsub.s32 1, %v649_v20  ;;  %v605_v50 = vld [vmem:[%s2773_s14] sm:$0xff]  ;;  %s2600_s28 = smov 112   ;;  %s2601_s22 = smov 48  }
  0x3a   : > { %2351 = vmatprep.subr.bf16.mxu0 %v2591_v11  ;;  %2268 = vmatpush3.msra.mxu1 %v605_v50  ;;  %s2602_s15 = smov 72   ;;  %s2603_s25 = smov 104  }
  0x3b   : > { %v651_v24 = vrot.slane %v599_v22, %v2823_v21  ;;  %v656_v27 = vrot.slane %v599_v22, %v2826_v23  ;;  %2277 = vmatprep.subr.mxu1 %v2593_v14  ;;  %s2604_s18 = smov 40   ;;  %s3090_s12 = scalar_lea.vmem %s3043_s5, %s2749_s13 }
  0x3c   : > { %p2171_p1 = scmp.ne.s32.totalorder %s2573_s24, 2 }
  0x3d   : > { %2353 = vmatpush3.bf16.msra.mxu0 %v2352_v15  ;;  %s3091_s27 = sld [smem:[#allocation22_spill]] (!%p2171_p1) }
  0x3e   : > { %2242 = vmatprep.subr.mxu0 %v2593_v14 }
  0xc4   : > { %v636_v3 = vpop.xlane.xlu0 %635 }
  0xc5   : > { %v638_v4 = vmul.f32 0.03125, %v636_v3 }
  0xc7   : > { %v639_v5 = vsub.f32 %v2805_v1, %v638_v4 }
  0xc9   : > { %v640_v6 = vmul.f32 %v639_v5, %v639_v5 }
  0xcb   : > { %v641_v7 = vsel %vm633_vm1, %v640_v6, 0.0  ;;  %v606_v6 = vld [vmem:[%s2773_s14 + $0x8] sm:$0xff] }
  0xcc   : > { %642 = vadd.xlane.f32.xlu0 %v641_v7 }
 0x159   : > { %v643_v16 = vpop.xlane.xlu0 %642 }
 0x15a   : > { %v644_v17 = vmul.f32 0.03125, %v643_v16 }
 0x15c   : > { %v645_v19 = vadd.f32 1e-06, %v644_v17 }
 0x15e   : > { %2469 = vrsqrt.f32 %v645_v19 }
 0x168   : > { %v2470_v25 = vpop.eup %2469 }
 0x169   : > { %v647_v26 = vmul.f32 %v2470_v25, %v639_v5 }
 0x16b   : > { %v652_v28 = vmul.f32 %v651_v24, %v647_v26 }
 0x16d   : > { %v657_v29 = vadd.f32 %v656_v27, %v652_v28 }
 0x16f   : > { %2240 = vmatmul.mubr.msk.f32.vlgmr.msra.gmra.mrb[0].mxu0 %vm633_vm1, %v657_v29 }
 0x170   : > { %2244 = vmatprep.mubr.msk.f32.mxu0 %vm2592_vm2, %v2593_v14 }
 0x242   : > { %v733_v31 = vpop.f32.mrb[0].mxu0 }
 0x243   : > { %v2838_v32 = vadd.f32 %v2149_v30, %v733_v31  ;;  %v2241_v33 = vpop.f32.mrb[1].mxu0 }
 0x244   : > { %v607_v33 = vld [vmem:[%s2773_s14 + $0x10] sm:$0xff] }
 0x245   : > { %827 = vrot.lane.b32.xlu0 %v2838_v32, %s2594_s23  ;;  %738 = vrot.lane.b32.xlu1 %v2838_v32, %s2595_s16 }
 0x249   : > { %905 = vrot.lane.b32.xlu0 %v2838_v32, %s2596_s30 }
 0x2b7   : > { %v739_v34 = vpop.permute.xlu1 %738  ;;  %v828_v35 = vpop.permute.xlu0 %827 }
 0x2b8   : > { %2243 = vmatpush3.xpose.msk.msra.mxu0 %vm740_vm3, %v739_v34 }
 0x2b9   : > { %2247 = vmatprep.subr.mxu0 %v2593_v14 }
 0x2bb   : > { %2245 = vmatmul.mubr.msk.f32.vlgmr.msra.gmra.mrb[2].mxu0 %vm740_vm3, %v2838_v32  ;;  %v906_v45 = vpop.permute.xlu0 %905 }
 0x2bc   : > { %2248 = vmatpush3.msra.mxu0 %v828_v35  ;;  %2249 = vmatprep.mubr.msk.f32.mxu0 %vm2592_vm2, %v2593_v14 }
 0x2bd   : > { %2252 = vmatprep.subr.mxu0 %v2593_v14 }
 0x38e   : > { %v811_v36 = vpop.f32.mrb[2].mxu0 }
 0x38f   : > { %v815_v37 = vmul.f32 0.35355338, %v811_v36  ;;  %v2246_v38 = vpop.f32.mrb[3].mxu0 }
 0x391   : > { %v816_v39 = vsel %vm740_vm3, %v815_v37, -inf }
 0x392   : > { %817 = vmax.xlane.f32.xlu1 %v816_v39 }
 0x41f   : > { %v818_v40 = vpop.xlane.xlu1 %817 }
 0x420   : > { %v819_v41 = vsub.f32 %v815_v37, %v818_v40 }
 0x422   : > { %v820_v42 = vmul.f32 1.442695, %v819_v41 }
 0x424   : > { %2471 = vpow2.f32 %v820_v42 }
 0x42e   : > { %v2472_v43 = vpop.eup %2471 }
 0x42f   : > { %v822_v44 = vsel %vm740_vm3, %v2472_v43, 0.0 }
 0x430   : > { %823 = vadd.xlane.f32.xlu0 %v822_v44 }
 0x446   : > { %903 = vrot.lane.b32.xlu0 %v2838_v32, %s2597_s19 }
 0x4bd   : > { %v824_v46 = vpop.xlane.xlu0 %823 }
 0x4be   : > { %2473 = vrcp.f32 %v824_v46  ;;  %v608_v46 = vld [vmem:[%s2773_s14 + $0x18] sm:$0xff] }
 0x4c1   : > { %v904_v49 = vpop.permute.xlu0 %903 }
 0x4c8   : > { %v2474_v47 = vpop.eup %2473 }
 0x4c9   : > { %v826_v48 = vmul.f32 %v2474_v47, %v2472_v43 }
 0x4cb   : > { %2250 = vmatmul.mubr.msk.f32.vlgmr.msra.gmra.mrb[4].mxu0 %vm740_vm3, %v826_v48 }
 0x4cc   : > { %2253 = vmatpush3.xpose.msk.msra.mxu0 %vm740_vm3, %v906_v45  ;;  %2254 = vmatprep.mubr.msk.f32.mxu0 %vm2592_vm2, %v2593_v14 }
 0x4cd   : > { %2257 = vmatprep.subr.mxu0 %v2593_v14 }
 0x4cf   : > { %2255 = vmatmul.mubr.msk.f32.vlgmr.msra.gmra.mrb[6].mxu0 %vm740_vm3, %v904_v49 }
 0x4d0   : > { %2259 = vmatprep.mubr.msk.f32.mxu0 %vm2592_vm2, %v2593_v14 }
 0x59e   : > { %v899_v51 = vpop.f32.mrb[4].mxu0 }
 0x59f   : > { %v2251_v52 = vpop.f32.mrb[5].mxu0  ;;  %2270 = vmatmul.mubr.msk.f32.vlgmr.msra.gmra.mrb[0].mxu1 %vm740_vm3, %v899_v51 }
 0x5a0   : > { %2279 = vmatprep.mubr.msk.f32.mxu1 %vm2592_vm2, %v2593_v14 }
 0x5a2   : > { %v977_v53 = vpop.f32.mrb[6].mxu0 }
 0x5a3   : > { %v981_v54 = vmul.f32 0.35355338, %v977_v53  ;;  %v2256_v55 = vpop.f32.mrb[7].mxu0 }
 0x5a5   : > { %v982_v56 = vsel %vm740_vm3, %v981_v54, -inf }
 0x5a6   : > { %983 = vmax.xlane.f32.xlu1 %v982_v56 }
 0x5b7   : > { %993 = vrot.lane.b32.xlu1 %v2838_v32, %s2598_s20 }
 0x5bb   : > { %1217 = vrot.lane.b32.xlu1 %v2838_v32, %s2599_s21 }
 0x5bf   : > { %1215 = vrot.lane.b32.xlu1 %v2838_v32, %s2600_s28 }
 0x633   : > { %v984_v57 = vpop.xlane.xlu1 %983 }
 0x634   : > { %v985_v58 = vsub.f32 %v981_v54, %v984_v57  ;;  %v2167_v57 = vld [vmem:[%s3090_s12] ss:$0 sm:$0xff] }
 0x636   : > { %v986_v59 = vmul.f32 1.442695, %v985_v58 }
 0x637   : > { %v994_v60 = vpop.permute.xlu1 %993 }
 0x638   : > { %2475 = vpow2.f32 %v986_v59  ;;  %2258 = vmatpush3.msra.mxu0 %v994_v60 }
 0x639   : > { %2262 = vmatprep.subr.mxu0 %v2593_v14 }
 0x63b   : > { %v1218_v7 = vpop.permute.xlu1 %1217 }
 0x63f   : > { %v1216_v10 = vpop.permute.xlu1 %1215 }
 0x642   : > { %v2476_v61 = vpop.eup %2475 }
 0x643   : > { %v988_v62 = vsel %vm740_vm3, %v2476_v61, 0.0 }
 0x644   : > { %989 = vadd.xlane.f32.xlu0 %v988_v62 }
 0x65a   : > { %1305 = vrot.lane.b32.xlu0 %v2838_v32, %s2601_s22 }
 0x65e   : > { %1457 = vrot.lane.b32.xlu0 %v2838_v32, %s2602_s15 }
 0x672   : > { %v1211_v63 = vpop.f32.mrb[0].mxu1 }
 0x673   : > { %v2271_v0 = vpop.f32.mrb[1].mxu1 }
 0x6d1   : > { %v990_v2 = vpop.xlane.xlu0 %989 }
 0x6d2   : > { %2477 = vrcp.f32 %v990_v2  ;;  %v611_v2 = vld [vmem:[%s2787_s2] sm:$0xff] }
 0x6d5   : > { %v1306_v3 = vpop.permute.xlu0 %1305 }
 0x6d6   : > { %2278 = vmatpush3.msra.mxu1 %v1306_v3  ;;  %v612_v3 = vld [vmem:[%s2787_s2 + $0x8] sm:$0xff] }
 0x6d7   : > { %2287 = vmatprep.subr.mxu1 %v2593_v14 }
 0x6d9   : > { %v1458_v27 = vpop.permute.xlu0 %1457 }
 0x6dc   : > { %v2478_v4 = vpop.eup %2477 }
 0x6dd   : > { %v992_v5 = vmul.f32 %v2478_v4, %v2476_v61  ;;  %v2355_v4 = vpack.c.bf16 %v612_v3, %v611_v2 }
 0x6df   : > { %2260 = vmatmul.mubr.msk.f32.vlgmr.msra.gmra.mrb[8].mxu0 %vm740_vm3, %v992_v5  ;;  %v614_v5 = vld [vmem:[%s2787_s2 + $0x18] sm:$0xff] }
 0x6e0   : > { %2263 = vmatpush3.msra.mxu0 %v606_v6  ;;  %2264 = vmatprep.mubr.msk.f32.mxu0 %vm2592_vm2, %v2593_v14 }
 0x6e1   : > { %2272 = vmatprep.subr.mxu0 %v2593_v14 }
 0x7b2   : > { %v1065_v8 = vpop.f32.mrb[8].mxu0 }
 0x7b3   : > { %v2261_v9 = vpop.f32.mrb[9].mxu0  ;;  %2265 = vmatmul.mubr.msk.f32.vlgmr.msra.gmra.mrb[10].mxu0 %vm740_vm3, %v1065_v8 }
 0x7b4   : > { %2273 = vmatpush3.xpose.msk.msra.mxu0 %vm740_vm3, %v1218_v7  ;;  %2274 = vmatprep.mubr.msk.f32.mxu0 %vm2592_vm2, %v2593_v14 }
 0x7b5   : > { %2282 = vmatprep.subr.mxu0 %v2593_v14 }
 0x7b7   : > { %2275 = vmatmul.mubr.msk.f32.vlgmr.msra.gmra.mrb[12].mxu0 %vm740_vm3, %v1216_v10  ;;  %v610_v10 = vld [vmem:[%s2782_s1] sm:$0x3] }
 0x7b8   : > { %2284 = vmatprep.mubr.msk.f32.mxu0 %vm2592_vm2, %v2593_v14  ;;  %2283 = vmatpush3.msra.mxu0 %v607_v33 }
 0x7b9   : > { %2292 = vmatprep.subr.mxu0 %v2593_v14 }
 0x886   : > { %v1138_v12 = vpop.f32.mrb[10].mxu0 }
 0x887   : > { %v1212_v13 = vadd.f32 %v1211_v63, %v1138_v12  ;;  %v2266_v15 = vpop.f32.mrb[11].mxu0  ;;  %v1719_v12 = vrot.slane %v610_v10, %v2823_v21 }
 0x888   : > { %v1724_v15 = vrot.slane %v610_v10, %v2826_v23 }
 0x88a   : > { %v1289_v16 = vpop.f32.mrb[12].mxu0 }
 0x88b   : > { %v1293_v17 = vmul.f32 0.35355338, %v1289_v16  ;;  %v2276_v18 = vpop.f32.mrb[13].mxu0 }
 0x88d   : > { %v1294_v19 = vsel %vm740_vm3, %v1293_v17, -inf }
 0x88e   : > { %1295 = vmax.xlane.f32.xlu1 %v1294_v19  ;;  %v616_v19 = vld [vmem:[%s2797_s17] sm:$0xff] }
 0x91b   : > { %v1296_v20 = vpop.xlane.xlu1 %1295 }
 0x91c   : > { %v1297_v22 = vsub.f32 %v1293_v17, %v1296_v20  ;;  %v617_v20 = vld [vmem:[%s2797_s17 + $0x8] sm:$0xff] }
 0x91e   : > { %v1298_v24 = vmul.f32 1.442695, %v1297_v22  ;;  %v2361_v22 = vpack.c.bf16 %v617_v20, %v616_v19 }
 0x920   : > { %2479 = vpow2.f32 %v1298_v24  ;;  %v618_v24 = vld [vmem:[%s2797_s17 + $0x10] sm:$0xff] }
 0x92a   : > { %v2480_v25 = vpop.eup %2479 }
 0x92b   : > { %v1300_v26 = vsel %vm740_vm3, %v2480_v25, 0.0 }
 0x92c   : > { %1301 = vadd.xlane.f32.xlu0 %v1300_v26 }
 0x942   : > { %1455 = vrot.lane.b32.xlu0 %v2838_v32, %s2603_s25 }
 0x9b9   : > { %v1302_v28 = vpop.xlane.xlu0 %1301 }
 0x9ba   : > { %2481 = vrcp.f32 %v1302_v28  ;;  %v621_v28 = vld [vmem:[%s2797_s17 + $0x28] sm:$0xff] }
 0x9bd   : > { %v1456_v31 = vpop.permute.xlu0 %1455 }
 0x9c4   : > { %v2482_v29 = vpop.eup %2481 }
 0x9c5   : > { %v1304_v30 = vmul.f32 %v2482_v29, %v2480_v25  ;;  %v619_v25 = vld [vmem:[%s2797_s17 + $0x18] sm:$0xff] }
 0x9c6   : > { %v2364_v26 = vpack.c.bf16 %v619_v25, %v618_v24 }
 0x9c7   : > { %2280 = vmatmul.mubr.msk.f32.vlgmr.msra.gmra.mrb[2].mxu1 %vm740_vm3, %v1304_v30  ;;  %v622_v30 = vld [vmem:[%s2797_s17 + $0x30] sm:$0xff] }
 0x9c8   : > { %2288 = vmatpush3.xpose.msk.msra.mxu1 %vm740_vm3, %v1458_v27  ;;  %2289 = vmatprep.mubr.msk.f32.mxu1 %vm2592_vm2, %v2593_v14  ;;  %v620_v27 = vld [vmem:[%s2797_s17 + $0x20] sm:$0xff] }
 0x9c9   : > { %2297 = vmatprep.subr.mxu1 %v2593_v14  ;;  %v2367_v29 = vpack.c.bf16 %v621_v28, %v620_v27 }
 0x9cb   : > { %2290 = vmatmul.mubr.msk.f32.vlgmr.msra.gmra.mrb[4].mxu1 %vm740_vm3, %v1456_v31  ;;  %v623_v31 = vld [vmem:[%s2797_s17 + $0x38] sm:$0xff] }
 0x9cc   : > { %2299 = vmatprep.mubr.msk.f32.mxu1 %vm2592_vm2, %v2593_v14  ;;  %2298 = vmatpush3.msra.mxu1 %v608_v46  ;;  %v2370_v33 = vpack.c.bf16 %v623_v31, %v622_v30  ;;  %v2168_v46 = vld [vmem:[%s582_s11] ss:$0 sm:$0xff] }
 0x9cd   : > { %2360 = vmatprep.subr.bf16.mxu1 %v2591_v11 }
 0xa9a   : > { %v1377_v34 = vpop.f32.mrb[2].mxu1 }
 0xa9b   : > { %v2281_v35 = vpop.f32.mrb[3].mxu1  ;;  %2285 = vmatmul.mubr.msk.f32.vlgmr.msra.gmra.mrb[14].mxu0 %vm740_vm3, %v1377_v34  ;;  %v624_v34 = vld [vmem:[%s2797_s17 + $0x40] sm:$0xff] }
 0xa9c   : > { %2294 = vmatprep.mubr.msk.f32.mxu0 %vm2592_vm2, %v2593_v14  ;;  %v625_v35 = vld [vmem:[%s2797_s17 + $0x48] sm:$0xff] }
 0xa9e   : > { %v1529_v36 = vpop.f32.mrb[4].mxu1 }
 0xa9f   : > { %v1533_v37 = vmul.f32 0.35355338, %v1529_v36  ;;  %v2291_v38 = vpop.f32.mrb[5].mxu1  ;;  %v2373_v36 = vpack.c.bf16 %v625_v35, %v624_v34 }
 0xaa0   : > { %v627_v38 = vld [vmem:[%s2797_s17 + $0x58] sm:$0xff] }
 0xaa1   : > { %v1534_v39 = vsel %vm740_vm3, %v1533_v37, -inf }
 0xaa2   : > { %1535 = vmax.xlane.f32.xlu1 %v1534_v39 }
 0xab3   : > { %1545 = vrot.lane.b32.xlu1 %v2838_v32, %s2604_s18 }
 0xb2f   : > { %v1536_v40 = vpop.xlane.xlu1 %1535 }
 0xb30   : > { %v1537_v41 = vsub.f32 %v1533_v37, %v1536_v40  ;;  %v626_v37 = vld [vmem:[%s2797_s17 + $0x50] sm:$0xff]  ;;  %v628_v40 = vld [vmem:[%s2797_s17 + $0x60] sm:$0xff] }
 0xb31   : > { %v2376_v39 = vpack.c.bf16 %v627_v38, %v626_v37 }
 0xb32   : > { %v1538_v42 = vmul.f32 1.442695, %v1537_v41  ;;  %v629_v41 = vld [vmem:[%s2797_s17 + $0x68] sm:$0xff] }
 0xb33   : > { %v1546_v43 = vpop.permute.xlu1 %1545 }
 0xb34   : > { %2483 = vpow2.f32 %v1538_v42  ;;  %2293 = vmatpush3.msra.mxu0 %v1546_v43  ;;  %v2379_v42 = vpack.c.bf16 %v629_v41, %v628_v40  ;;  %v630_v43 = vld [vmem:[%s2797_s17 + $0x70] sm:$0xff] }
 0xb35   : > { %2354 = vmatprep.subr.bf16.mxu0 %v2591_v11 }
 0xb3e   : > { %v2484_v44 = vpop.eup %2483 }
 0xb3f   : > { %v1540_v45 = vsel %vm740_vm3, %v2484_v44, 0.0 }
 0xb40   : > { %1541 = vadd.xlane.f32.xlu0 %v1540_v45 }
 0xb6e   : > { %v1450_v47 = vpop.f32.mrb[14].mxu0 }
 0xb6f   : > { %v1454_v48 = vadd.f32 %v1450_v47, %v1212_v13  ;;  %v2286_v32 = vpop.f32.mrb[15].mxu0 }
 0xbcd   : > { %v1542_v49 = vpop.xlane.xlu0 %1541 }
 0xbce   : > { %2485 = vrcp.f32 %v1542_v49 }
 0xbd8   : > { %v2486_v50 = vpop.eup %2485 }
 0xbd9   : > { %v1544_v51 = vmul.f32 %v2486_v50, %v2484_v44  ;;  %v631_v44 = vld [vmem:[%s2797_s17 + $0x78] sm:$0xff] }
 0xbda   : > { %v2382_v45 = vpack.c.bf16 %v631_v44, %v630_v43 }
 0xbdb   : > { %2295 = vmatmul.mubr.msk.f32.vlgmr.msra.gmra.mrb[16].mxu0 %vm740_vm3, %v1544_v51 }
 0xbdc   : > { %2310 = vmatprep.mubr.msk.f32.mxu0 %vm2592_vm2, %v2593_v14  ;;  %2356 = vmatpush3.bf16.msra.mxu0 %v2355_v4 }
 0xbdd   : > { %2357 = vmatprep.subr.bf16.mxu0 %v2591_v11 }
 0xcae   : > { %v1617_v52 = vpop.f32.mrb[16].mxu0 }
 0xcaf   : > { %v2296_v53 = vpop.f32.mrb[17].mxu0  ;;  %2300 = vmatmul.mubr.msk.f32.vlgmr.msra.gmra.mrb[6].mxu1 %vm740_vm3, %v1617_v52 }
 0xcb0   : > { %2345 = vmatprep.mubr.msk.f32.mxu1 %vm2592_vm2, %v2593_v14  ;;  %2362 = vmatpush3.bf16.msra.mxu1 %v2361_v22 }
 0xcb1   : > { %2363 = vmatprep.subr.bf16.mxu1 %v2591_v11 }
 0xcb4   : > { %2365 = vmatpush3.bf16.msra.mxu1 %v2364_v26 }
 0xcb5   : > { %2366 = vmatprep.subr.bf16.mxu1 %v2591_v11 }
 0xcb8   : > { %2368 = vmatpush3.bf16.msra.mxu1 %v2367_v29 }
 0xcb9   : > { %2369 = vmatprep.subr.bf16.mxu1 %v2591_v11 }
 0xcbc   : > { %2371 = vmatpush3.bf16.msra.mxu1 %v2370_v33 }
 0xcbd   : > { %2372 = vmatprep.subr.bf16.mxu1 %v2591_v11 }
 0xcc0   : > { %2374 = vmatpush3.bf16.msra.mxu1 %v2373_v36 }
 0xcc1   : > { %2375 = vmatprep.subr.bf16.mxu1 %v2591_v11 }
 0xcc4   : > { %2377 = vmatpush3.bf16.msra.mxu1 %v2376_v39 }
 0xcc5   : > { %2378 = vmatprep.subr.bf16.mxu1 %v2591_v11 }
 0xcc8   : > { %2380 = vmatpush3.bf16.msra.mxu1 %v2379_v42 }
 0xcc9   : > { %2381 = vmatprep.subr.bf16.mxu1 %v2591_v11 }
 0xccc   : > { %2383 = vmatpush3.bf16.msra.mxu1 %v2382_v45 }
 0xd82   : > { %v1690_v54 = vpop.f32.mrb[6].mxu1 }
 0xd83   : > { %v1694_v55 = vadd.f32 %v1690_v54, %v1454_v48  ;;  %v2301_v56 = vpop.f32.mrb[7].mxu1 }
 0xd85   : > { %v1695_v58 = vadd.f32 %v1694_v55, %v2805_v1  ;;  %v613_v1 = vld [vmem:[%s2787_s2 + $0x10] sm:$0xff] }
 0xd86   : > { %v2358_v6 = vpack.c.bf16 %v614_v5, %v613_v1 }
 0xd87   : > { %v2922_v59 = vadd.f32 %v2167_v57, %v1695_v58 }
 0xd88   : > { %2359 = vmatpush3.bf16.msra.mxu0 %v2358_v6 }
 0xd89   : > { %v1703_v60 = vsel %vm633_vm1, %v2922_v59, 0.0 }
 0xd8a   : > { %1704 = vadd.xlane.f32.xlu1 %v1703_v60 }
 0xe17   : > { %v1705_v14 = vpop.xlane.xlu1 %1704 }
 0xe18   : > { %v1706_v61 = vmul.f32 0.03125, %v1705_v14 }
 0xe1a   : > { %v1707_v62 = vsub.f32 %v2922_v59, %v1706_v61 }
 0xe1c   : > { %v1708_v63 = vmul.f32 %v1707_v62, %v1707_v62 }
 0xe1e   : > { %v1709_v0 = vsel %vm633_vm1, %v1708_v63, 0.0 }
 0xe1f   : > { %1710 = vadd.xlane.f32.xlu0 %v1709_v0 }
 0xeac   : > { %v1711_v7 = vpop.xlane.xlu0 %1710 }
 0xead   : > { %v1712_v8 = vmul.f32 0.03125, %v1711_v7 }
 0xeaf   : > { %v1713_v9 = vadd.f32 1e-06, %v1712_v8 }
 0xeb1   : > { %2487 = vrsqrt.f32 %v1713_v9  ;;  %v2170_v9 = vld [vmem:[%s590_s0] ss:$0 sm:$0xff] }
 0xebb   : > { %v2488_v13 = vpop.eup %2487 }
 0xebc   : > { %v1715_v16 = vmul.f32 %v2488_v13, %v1707_v62 }
 0xebe   : > { %v1720_v17 = vmul.f32 %v1719_v12, %v1715_v16 }
 0xec0   : > { %v1725_v18 = vadd.f32 %v1724_v15, %v1720_v17 }
 0xec2   : > { %2311 = vmatmul.mubr.msk.f32.vlgmr.msra.gmra.mrb[18].mxu0 %vm633_vm1, %v1725_v18 }
 0xf95   : > { %v1801_v47 = vpop.f32.mrb[18].mxu0 }
 0xf96   : > { %v1802_v48 = vadd.f32 %v2168_v46, %v1801_v47  ;;  %v2312_v32 = vpop.f32.mrb[19].mxu0 }
 0xf98   : > { %v1806_v49 = vmul.f32 0.70710677, %v1802_v48  ;;  %v1805_v6 = vmul.f32 0.5, %v1802_v48 }
 0xf9a   : > { %v1807_v50 = vand.u32 2147483647, %v1806_v49  ;;  %vm1827_vm4 = vcmp.lt.f32.partialorder %v1806_v49, 0.0 }
 0xf9c   : > { %v1808_v51 = vmul.f32 0.3275911, %v1807_v50  ;;  %v1821_v53 = vmul.f32 %v1807_v50, %v1807_v50 }
 0xf9e   : > { %v1809_v52 = vadd.f32 1.0, %v1808_v51  ;;  %v1822_v11 = vsub.f32 0.0, %v1821_v53 }
 0xfa0   : > { %2489 = vrcp.f32 %v1809_v52  ;;  %v1823_v57 = vmul.f32 1.442695, %v1822_v11 }
 0xfa2   : > { %2491 = vpow2.f32 %v1823_v57 }
 0xfaa   : > { %v2490_v54 = vpop.eup %2489 }
 0xfab   : > { %v1812_v55 = vmul.f32 1.0614054, %v2490_v54 }
 0xfac   : > { %v2492_v2 = vpop.eup %2491 }
 0xfad   : > { %v1813_v56 = vadd.f32 -1.4531521, %v1812_v55 }
 0xfaf   : > { %v1814_v58 = vmul.f32 %v2490_v54, %v1813_v56 }
 0xfb1   : > { %v1815_v60 = vadd.f32 1.4214138, %v1814_v58 }
 0xfb3   : > { %v1816_v14 = vmul.f32 %v2490_v54, %v1815_v60 }
 0xfb5   : > { %v1817_v61 = vadd.f32 -0.28449672, %v1816_v14 }
 0xfb7   : > { %v1818_v62 = vmul.f32 %v2490_v54, %v1817_v61 }
 0xfb9   : > { %v1819_v63 = vadd.f32 0.2548296, %v1818_v62 }
 0xfbb   : > { %v1820_v0 = vmul.f32 %v2490_v54, %v1819_v63 }
 0xfbd   : > { %v1825_v3 = vmul.f32 %v2492_v2, %v1820_v0 }
 0xfbf   : > { %v1826_v4 = vsub.f32 1.0, %v1825_v3 }
 0xfc1   : > { %v1828_v1 = vsub.f32 0.0, %v1826_v4 }
 0xfc3   : > { %v1829_v5 = vsel %vm1827_vm4, %v1828_v1, %v1826_v4 }
 0xfc4   : > { %v1830_v7 = vadd.f32 1.0, %v1829_v5 }
 0xfc6   : > { %v1831_v8 = vmul.f32 %v1830_v7, %v1805_v6 }
 0xfc8   : > { %2346 = vmatmul.mubr.f32.vlgmr.msra.gmra.mrb[8].mxu1 %v1831_v8 }
0x109a   : > { %1913 = sbr.rel (%p2171_p1) target bundleno = 4570 (0x11da), region = 76 }
0x109b   : > { %v1904_v10 = vpop.f32.mrb[8].mxu1 }
0x109c   : > { %v1905_v12 = vadd.f32 %v2170_v9, %v1904_v10  ;;  %v2347_v13 = vpop.f32.mrb[9].mxu1 }
0x109e   : > { %v1908_v15 = vadd.f32 %v1905_v12, %v2922_v59  ;;  %v1914_v59 = vld [vmem:[%s3091_s27] sm:$0x3] (!%p2171_p1) }
0x109f   : > { %v1931_v27 = vrot.slane (!%p2171_p1), %v1914_v59, %v2823_v21  ;;  %v1936_v30 = vrot.slane (!%p2171_p1), %v1914_v59, %v2826_v23 }
0x10a0   : > { %1909 = vst.msk [vmem:[#allocation2] sm:$0xff] %vm633_vm1, %v1908_v15  ;;  %v1915_v16 = vsel (!%p2171_p1), %vm633_vm1, %v1908_v15, 0.0 }
0x10a1   : > { %1916 = vadd.xlane.f32.xlu0 %v1915_v16 }
0x112e   : > { %v1917_v17 = vpop.xlane.xlu0 %1916 }
0x112f   : > { %v1918_v18 = vmul.f32 0.03125, %v1917_v17 }
0x1131   : > { %v1919_v19 = vsub.f32 %v1908_v15, %v1918_v18 }
0x1133   : > { %v1920_v20 = vmul.f32 %v1919_v19, %v1919_v19 }
0x1135   : > { %v1921_v22 = vsel %vm633_vm1, %v1920_v20, 0.0 }
0x1136   : > { %1922 = vadd.xlane.f32.xlu0 %v1921_v22 }
0x11c3   : > { %v1923_v24 = vpop.xlane.xlu0 %1922 }
0x11c4   : > { %v1924_v25 = vmul.f32 0.03125, %v1923_v24 }
0x11c6   : > { %v1925_v26 = vadd.f32 1e-06, %v1924_v25 }
0x11c8   : > { %2493 = vrsqrt.f32 %v1925_v26 }
0x11d2   : > { %v2494_v28 = vpop.eup %2493 }
0x11d3   : > { %v1927_v29 = vmul.f32 %v2494_v28, %v1919_v19 }
0x11d5   : > { %v1932_v31 = vmul.f32 %v1931_v27, %v1927_v29 }
0x11d7   : > { %v1937_v33 = vadd.f32 %v1936_v30, %v1932_v31 }
0x11d9   : > { %1938 = vst.msk [vmem:[%s546_s26] sm:$0xff] %vm633_vm1, %v1937_v33 }
0x11da PF: > { %s3092_s24 = sld [smem:[#allocation9_spill]]  ;;  %s3095_s21 = sld [smem:[#allocation23_spill]] }
0x11db   : > { %s3093_s23 = sld [smem:[#allocation7_spill]]  ;;  %s1953_s22 = sshll.u32 %s546_s26, 4  ;;  %s1954_s22 = int_to_ptr.vmem [resolvable:$true] %s1953_s22 }
0x11dc   : > { %s2495_s14 = scalar_lea.vmem %s1954_s22, 128  ;;  %s2605_s4 = smov [#allocation3]  }
0x11dd   : > { %p2496_p2 = scmp.ne.s32.totalorder %s1954_s22, %s2495_s14  ;;  %s2499_s12 = sshll.u32 %s2605_s4, 4  ;;  %s2500_s12 = int_to_ptr.vmem [resolvable:$false] %s2499_s12 }
0x11de   : > { %s2501_s1 = scalar_lea.vmem %s2500_s12, 256  ;;  %p2502_p6 = scmp.lt.s32.totalorder %s1954_s22, %s2500_s12 }
0x11df   : > { %p2497_p4 = pnand %p2496_p2, %p2720_p3  ;;  %p2503_p7 = scmp.lt.s32.totalorder %s2501_s1, %s2495_s14 }
0x11e0   : > { %s2173_s30 = sshll.u32 %s3092_s24, 7  ;;  %s3096_s15 = smov %s3095_s21 }
0x11e1   : > { %s2987_s28 = scalar_lea.hbm %s3095_s21, %s2173_s30  ;;  %s3097_s25 = sand.u32 1, %s3093_s23  }
0x11e2   : > { %s1940_s18 = scalar_lea.sflag [#allocation4], %s3097_s25  ;;  %p2498_p5 = pneg %p2497_p4 }
0x11e3   : > { %p2504_p8 = por %p2503_p7, %p2502_p6 }
0x11e5   : > { %p2505_p10 = pnand %p2504_p8, %p2498_p5 }
0x11e7   : > { %2508 = shalt.err (!%p2505_p10)
}
0x11e8   : > { %s2509_s29 = scalar_lea.hbm %s2987_s28, 128  ;;  %s2513_s11 = scalar_lea.hbm %s3096_s15, 256 }
0x11e9   : > { %p2510_p11 = scmp.ne.s32.totalorder %s2987_s28, %s2509_s29  ;;  %p2514_p0 = scmp.lt.u32.totalorder %s2987_s28, %s3096_s15 }
0x11ea   : > { %p2515_p1 = scmp.lt.u32.totalorder %s2513_s11, %s2509_s29  ;;  %p2517_p4 = scmp.lt.u32.totalorder %s2509_s29, %s2987_s28 }
0x11eb   : > { %p2511_p12 = pnand %p2510_p11, %p2720_p3 }
0x11ec   : > { %p2516_p2 = por %p2515_p1, %p2514_p0 }
0x11ed   : > { %p2512_p13 = pneg %p2511_p12 }
0x11ee   : > { %p2518_p5 = por %p2517_p4, %p2516_p2 }
0x11f0   : > { %p2519_p6 = pnand %p2518_p5, %p2512_p13 }
0x11f2   : > { %2522 = shalt.err (!%p2519_p6)
}
0x11f3   : > { %2384 = dma.vmem_to_hbm [thread:$0]  (%p2720_p3), %s1954_s22, 128, %s2987_s28, %s1940_s18  }
0x11f4 PF: > { %s3098_s0 = sld [smem:[#allocation12_spill]]  ;;  %s3099_s27 = sld [smem:[#allocation6_spill]] }
0x11fa   : > { %p2390_p7 = scmp.ge.s32.totalorder %s3098_s0, 2  ;;  %s1965_s23 = sand.u32 1, %s3099_s27  }
0x11fb   : > { %s1966_s30 = scalar_lea.sflag [#allocation4], %s1965_s23 }
0x11fc   : > { %p2387_p8 = pnand %p2390_p7, %p2730_p9 }
0x11fe   : > { %2556 = dma.done.wait (!%p2387_p8), %s1966_s30, 128  }
0x11ff   : > { %2558 = vsyncadd (!%p2387_p8), %s1966_s30, 4294967168  ;;  %s25_s28 = sadd.s32 1, %s3098_s0   ;;  %s3101_s21 = sld [smem:[#allocation7_spill]] }
0x1200   : > { %p22_p10 = scmp.ge.s32.totalorder %s25_s28, 8   ;;  %s3102_s22 = sld [smem:[#allocation8_spill]] }
0x1201   : > { %s3103_s23 = sld [smem:[#allocation17_spill]]  ;;  %s3104_s24 = sld [smem:[#allocation10_spill]] }
0x1202   : > { %s3105_s25 = sld [smem:[#allocation11_spill]]  ;;  %s3106_s26 = sld [smem:[#allocation13_spill]] }
0x1203   : > { %s3107_s27 = sld [smem:[#allocation15_spill]]  ;;  %24 = sbr.rel (!%p22_p10) target bundleno = 12 (0xc), region = 141 }
0x120a   :  { %1971 = vsyncpa [#allocation4], 1 }
0x120b   :  { %1973 = vsyncpa [#allocation4 + $0x1], 1 }

</bundles_post_ra>
